<compile_context>
chip_gen: v7x
topology: tpu7x:2x2x1
jax: 0.10.0
libtpu: 0.0.40
codegen_flags: <defaults>
</compile_context>

<pallas_src>
import jax
import jax.numpy as jnp
from jax import lax
from jax.experimental import pallas as pl
from jax.experimental.pallas import tpu as pltpu

NEG_SLOPE = -1.9890641
H = W = 16            # input spatial size
OH = OW = 9           # conv2 output spatial size
LC_MAX = 256          # in-kernel lane-chunk size (keeps accumulators < 64 vregs)


def _round_up(a, b):
    return (a + b - 1) // b * b


def _pick_block(n):
    """Choose images-per-grid-step (lane block) and padded batch size."""
    n128 = _round_up(max(n, 1), 128)
    nb = None
    # Largest block <= 1024 that still leaves >= 2 grid steps (v7x megacore).
    for cand in (1024, 512, 256, 128):
        if n128 >= 2 * cand:
            nb = cand
            break
    if nb is None:        # tiny batch: single step
        nb = n128
    n_pad = _round_up(n128, nb)
    return nb, n_pad


def fused_conv_kernel(xd_ref, w1_ref, b1_ref, w2_ref, b2_ref, o_ref, e_ref):
    # xd_ref: (8, 9, 9, NB) VMEM — de-interleaved conv1-padded input planes.
    #         flat index = plane*2 + c, plane = row_parity*2 + col_parity,
    #         xd[plane*2+c, i, j, n] = xpad[n, c, 2*i + row_parity, 2*j + col_parity]
    # w1_ref: (18,) SMEM   conv1 weights, flattened [c_in, kh, kw]
    # b1_ref: (1,)  SMEM
    # w2_ref: (8,)  SMEM   conv2 weights, flattened [oc, kh, kw]
    # b2_ref: (2,)  SMEM
    # o_ref : (2, 9, 9, NB) VMEM — output block, batch on lanes
    # e_ref : (10, 10, NB)  VMEM scratch — zero-bordered even-pixel grid E
    nb = xd_ref.shape[-1]
    lc = min(nb, LC_MAX)

    # ---- hoist all scalar (SMEM) weight reads to the top of the kernel ----
    w1s = [w1_ref[k] for k in range(18)]
    b1s = b1_ref[0]
    w2s = [w2_ref[k] for k in range(8)]
    b2s = (b2_ref[0], b2_ref[1])

    # Strip-mine the lane (batch) axis so per-chunk live data stays small.
    for chunk in range(nb // lc):
        l0 = chunk * lc
        ls = slice(l0, l0 + lc)

        # ---- conv1, evaluated only at even output pixels (all conv2 reads) ----
        # Each tap is read straight off the Ref as an (8,8,lc) window; no full
        # parity-plane materialization.
        acc = jnp.full((8, 8, lc), b1s, dtype=jnp.float32)
        for c in range(2):
            for kh in range(3):
                for kw in range(3):
                    p = (kh % 2) * 2 + (kw % 2)          # parity plane
                    di, dj = kh // 2, kw // 2            # shift inside plane
                    tap = xd_ref[p * 2 + c, di:di + 8, dj:dj + 8, ls]
                    acc = acc + tap * w1s[c * 9 + kh * 3 + kw]
        ve = jnp.where(acc > 0, acc, acc * NEG_SLOPE)     # (8, 8, lc)

        # ---- build zero-bordered even grid E: zero only the border strips
        # (rows 0/9, cols 0/9); the 8x8 interior is overwritten right away ----
        zrow = jnp.zeros((1, 10, lc), jnp.float32)
        zcol = jnp.zeros((8, 1, lc), jnp.float32)
        e_ref[0:1, :, ls] = zrow
        e_ref[9:10, :, ls] = zrow
        e_ref[1:9, 0:1, ls] = zcol
        e_ref[1:9, 9:10, ls] = zcol
        e_ref[1:9, 1:9, ls] = ve

        # ---- conv2 (2x2, stride 2, dilation 2, pad 2) == 2x2 valid conv on E.
        # Taps are Ref-sliced windows; output channels handled one at a time
        # so only one (9,9,lc) accumulator is live. ----
        for oc in range(2):
            acc2 = jnp.full((OH, OW, lc), b2s[oc], dtype=jnp.float32)
            for kh in range(2):
                for kw in range(2):
                    tap = e_ref[kh:kh + OH, kw:kw + OW, ls]
                    acc2 = acc2 + tap * w2s[oc * 4 + kh * 2 + kw]
            o_ref[oc, :, :, ls] = jnp.where(acc2 > 0, acc2, acc2 * NEG_SLOPE)


def model_forward(x, w1, b1, w2, b2):
    # x: (N, 2, 16, 16) float32, NCHW
    n = x.shape[0]
    nb, n_pad = _pick_block(n)
    grid = n_pad // nb

    # Wrapper-side layout plumbing (fused by XLA): pad batch to a multiple of
    # nb, apply conv1's padding=1, de-interleave into 4 parity planes and put
    # the batch axis last (on lanes).
    # NOTE: the de-interleave could be moved in-kernel (stride-2 ref slices)
    # to cut one HBM pass; kept here for robustness of lowering.
    xb = jnp.pad(x.astype(jnp.float32), ((0, n_pad - n), (0, 0), (0, 0), (0, 0)))
    xpad = jnp.pad(xb, ((0, 0), (0, 0), (1, 1), (1, 1)))          # (NP, 2, 18, 18)
    planes = jnp.stack([xpad[:, :, 0::2, 0::2],                   # even row, even col
                        xpad[:, :, 0::2, 1::2],                   # even row, odd  col
                        xpad[:, :, 1::2, 0::2],                   # odd  row, even col
                        xpad[:, :, 1::2, 1::2]], axis=0)          # (4, NP, 2, 9, 9)
    xd = jnp.transpose(planes, (0, 2, 3, 4, 1)).reshape(8, 9, 9, n_pad)

    w1f = w1.reshape(-1).astype(jnp.float32)          # (1,2,3,3) -> (18,)
    w2f = w2.reshape(-1).astype(jnp.float32)          # (2,1,2,2) -> (8,)

    out_t = pl.pallas_call(
        fused_conv_kernel,
        out_shape=jax.ShapeDtypeStruct((2, OH, OW, n_pad), jnp.float32),
        grid_spec=pltpu.PrefetchScalarGridSpec(
            num_scalar_prefetch=0,
            grid=(grid,),
            in_specs=[
                pl.BlockSpec((8, 9, 9, nb), lambda i: (0, 0, 0, i)),
                pl.BlockSpec(memory_space=pltpu.MemorySpace.SMEM),
                pl.BlockSpec(memory_space=pltpu.MemorySpace.SMEM),
                pl.BlockSpec(memory_space=pltpu.MemorySpace.SMEM),
                pl.BlockSpec(memory_space=pltpu.MemorySpace.SMEM),
            ],
            out_specs=pl.BlockSpec((2, OH, OW, nb), lambda i: (0, 0, 0, i)),
            scratch_shapes=[pltpu.VMEM((10, 10, nb), jnp.float32)],
        ),
        compiler_params=pltpu.CompilerParams(dimension_semantics=("parallel",)),
    )(xd, w1f, b1.astype(jnp.float32), w2f, b2.astype(jnp.float32))

    # (2, 9, 9, NP) -> (N, 2, 9, 9)
    return jnp.transpose(out_t, (3, 0, 1, 2))[:n]


def reference_forward(x, w1, b1, w2, b2):
    # Pure-JAX reference of the PyTorch forward (for correctness check).
    dn = ("NCHW", "OIHW", "NCHW")
    v1 = lax.conv_general_dilated(x, w1, window_strides=(1, 1),
                                  padding=((1, 1), (1, 1)),
                                  dimension_numbers=dn) + b1.reshape(1, -1, 1, 1)
    v4 = jnp.where(v1 > 0, v1, v1 * NEG_SLOPE)
    v5 = lax.conv_general_dilated(v4, w2, window_strides=(2, 2),
                                  padding=((2, 2), (2, 2)),
                                  rhs_dilation=(2, 2),
                                  dimension_numbers=dn) + b2.reshape(1, -1, 1, 1)
    return jnp.where(v5 > 0, v5, v5 * NEG_SLOPE)


if __name__ == "__main__":
    key = jax.random.PRNGKey(0)
    kx, k1, k2, k3, k4 = jax.random.split(key, 5)

    # Deterministic parameter init (PyTorch-style uniform(-1/sqrt(fan_in), ...)).
    fan1 = 2 * 3 * 3
    fan2 = 1 * 2 * 2
    w1 = jax.random.uniform(k1, (1, 2, 3, 3), jnp.float32,
                            -1.0 / jnp.sqrt(fan1), 1.0 / jnp.sqrt(fan1))
    b1 = jax.random.uniform(k2, (1,), jnp.float32,
                            -1.0 / jnp.sqrt(fan1), 1.0 / jnp.sqrt(fan1))
    w2 = jax.random.uniform(k3, (2, 1, 2, 2), jnp.float32,
                            -1.0 / jnp.sqrt(fan2), 1.0 / jnp.sqrt(fan2))
    b2 = jax.random.uniform(k4, (2,), jnp.float32,
                            -1.0 / jnp.sqrt(fan2), 1.0 / jnp.sqrt(fan2))

    x = jax.random.normal(kx, (2, 2, H, W), jnp.float32)

    out = jax.block_until_ready(model_forward(x, w1, b1, w2, b2))

    ref = reference_forward(x, w1, b1, w2, b2)
    assert out.shape == (2, 2, OH, OW), out.shape
    assert jnp.allclose(out, ref, atol=1e-4, rtol=1e-4), float(jnp.max(jnp.abs(out - ref)))

    print("KERNEL_OK")
</pallas_src>

<mosaic_0001>
module attributes {stable_mosaic.version = 11 : i64} {
  func.func @fused_conv_kernel(%arg0: i32, %arg1: memref<8x9x9x128xf32, #tpu.memory_space<vmem>>, %arg2: memref<18xf32, #tpu.memory_space<smem>>, %arg3: memref<1xf32, #tpu.memory_space<smem>>, %arg4: memref<8xf32, #tpu.memory_space<smem>>, %arg5: memref<2xf32, #tpu.memory_space<smem>>, %arg6: memref<2x9x9x128xf32, #tpu.memory_space<vmem>>, %arg7: memref<10x10x128xf32, #tpu.memory_space<vmem>>) attributes {dimension_semantics = [#tpu.dimension_semantics<parallel>], iteration_bounds = array<i64: 1>, scalar_prefetch = 0 : i64, scratch_operands = 1 : i64, tpu.core_type = #tpu.core_type<tc>, window_params = [{transform_indices = @transform_0, window_bounds = array<i64: 8, 9, 9, 128>}, {transform_indices = @transform_1, window_bounds = array<i64: 18>}, {transform_indices = @transform_2, window_bounds = array<i64: 1>}, {transform_indices = @transform_3, window_bounds = array<i64: 8>}, {transform_indices = @transform_4, window_bounds = array<i64: 2>}, {transform_indices = @transform_5, window_bounds = array<i64: 2, 9, 9, 128>}]} {
    %c0 = arith.constant 0 : index
    %0 = memref.load %arg2[%c0] : memref<18xf32, #tpu.memory_space<smem>>
    %c1 = arith.constant 1 : index
    %1 = memref.load %arg2[%c1] : memref<18xf32, #tpu.memory_space<smem>>
    %c2 = arith.constant 2 : index
    %2 = memref.load %arg2[%c2] : memref<18xf32, #tpu.memory_space<smem>>
    %c3 = arith.constant 3 : index
    %3 = memref.load %arg2[%c3] : memref<18xf32, #tpu.memory_space<smem>>
    %c4 = arith.constant 4 : index
    %4 = memref.load %arg2[%c4] : memref<18xf32, #tpu.memory_space<smem>>
    %c5 = arith.constant 5 : index
    %5 = memref.load %arg2[%c5] : memref<18xf32, #tpu.memory_space<smem>>
    %c6 = arith.constant 6 : index
    %6 = memref.load %arg2[%c6] : memref<18xf32, #tpu.memory_space<smem>>
    %c7 = arith.constant 7 : index
    %7 = memref.load %arg2[%c7] : memref<18xf32, #tpu.memory_space<smem>>
    %c8 = arith.constant 8 : index
    %8 = memref.load %arg2[%c8] : memref<18xf32, #tpu.memory_space<smem>>
    %c9 = arith.constant 9 : index
    %9 = memref.load %arg2[%c9] : memref<18xf32, #tpu.memory_space<smem>>
    %c10 = arith.constant 10 : index
    %10 = memref.load %arg2[%c10] : memref<18xf32, #tpu.memory_space<smem>>
    %c11 = arith.constant 11 : index
    %11 = memref.load %arg2[%c11] : memref<18xf32, #tpu.memory_space<smem>>
    %c12 = arith.constant 12 : index
    %12 = memref.load %arg2[%c12] : memref<18xf32, #tpu.memory_space<smem>>
    %c13 = arith.constant 13 : index
    %13 = memref.load %arg2[%c13] : memref<18xf32, #tpu.memory_space<smem>>
    %c14 = arith.constant 14 : index
    %14 = memref.load %arg2[%c14] : memref<18xf32, #tpu.memory_space<smem>>
    %c15 = arith.constant 15 : index
    %15 = memref.load %arg2[%c15] : memref<18xf32, #tpu.memory_space<smem>>
    %c16 = arith.constant 16 : index
    %16 = memref.load %arg2[%c16] : memref<18xf32, #tpu.memory_space<smem>>
    %c17 = arith.constant 17 : index
    %17 = memref.load %arg2[%c17] : memref<18xf32, #tpu.memory_space<smem>>
    %c0_0 = arith.constant 0 : index
    %18 = memref.load %arg3[%c0_0] : memref<1xf32, #tpu.memory_space<smem>>
    %c0_1 = arith.constant 0 : index
    %19 = memref.load %arg4[%c0_1] : memref<8xf32, #tpu.memory_space<smem>>
    %c1_2 = arith.constant 1 : index
    %20 = memref.load %arg4[%c1_2] : memref<8xf32, #tpu.memory_space<smem>>
    %c2_3 = arith.constant 2 : index
    %21 = memref.load %arg4[%c2_3] : memref<8xf32, #tpu.memory_space<smem>>
    %c3_4 = arith.constant 3 : index
    %22 = memref.load %arg4[%c3_4] : memref<8xf32, #tpu.memory_space<smem>>
    %c4_5 = arith.constant 4 : index
    %23 = memref.load %arg4[%c4_5] : memref<8xf32, #tpu.memory_space<smem>>
    %c5_6 = arith.constant 5 : index
    %24 = memref.load %arg4[%c5_6] : memref<8xf32, #tpu.memory_space<smem>>
    %c6_7 = arith.constant 6 : index
    %25 = memref.load %arg4[%c6_7] : memref<8xf32, #tpu.memory_space<smem>>
    %c7_8 = arith.constant 7 : index
    %26 = memref.load %arg4[%c7_8] : memref<8xf32, #tpu.memory_space<smem>>
    %c0_9 = arith.constant 0 : index
    %27 = memref.load %arg5[%c0_9] : memref<2xf32, #tpu.memory_space<smem>>
    %c1_10 = arith.constant 1 : index
    %28 = memref.load %arg5[%c1_10] : memref<2xf32, #tpu.memory_space<smem>>
    %29 = vector.broadcast %18 : f32 to vector<8x8x128xf32>
    %c0_11 = arith.constant 0 : index
    %c0_12 = arith.constant 0 : index
    %c0_13 = arith.constant 0 : index
    %c0_14 = arith.constant 0 : index
    %30 = vector.load %arg1[%c0_11, %c0_12, %c0_13, %c0_14] : memref<8x9x9x128xf32, #tpu.memory_space<vmem>>, vector<1x8x8x128xf32>
    %31 = vector.shape_cast %30 : vector<1x8x8x128xf32> to vector<8x8x128xf32>
    %32 = vector.broadcast %0 : f32 to vector<8x8x128xf32>
    %33 = arith.mulf %31, %32 : vector<8x8x128xf32>
    %34 = arith.addf %29, %33 : vector<8x8x128xf32>
    %c2_15 = arith.constant 2 : index
    %c0_16 = arith.constant 0 : index
    %c0_17 = arith.constant 0 : index
    %c0_18 = arith.constant 0 : index
    %35 = vector.load %arg1[%c2_15, %c0_16, %c0_17, %c0_18] : memref<8x9x9x128xf32, #tpu.memory_space<vmem>>, vector<1x8x8x128xf32>
    %36 = vector.shape_cast %35 : vector<1x8x8x128xf32> to vector<8x8x128xf32>
    %37 = vector.broadcast %1 : f32 to vector<8x8x128xf32>
    %38 = arith.mulf %36, %37 : vector<8x8x128xf32>
    %39 = arith.addf %34, %38 : vector<8x8x128xf32>
    %c0_19 = arith.constant 0 : index
    %c0_20 = arith.constant 0 : index
    %c1_21 = arith.constant 1 : index
    %c0_22 = arith.constant 0 : index
    %40 = vector.load %arg1[%c0_19, %c0_20, %c1_21, %c0_22] : memref<8x9x9x128xf32, #tpu.memory_space<vmem>>, vector<1x8x8x128xf32>
    %41 = vector.shape_cast %40 : vector<1x8x8x128xf32> to vector<8x8x128xf32>
    %42 = vector.broadcast %2 : f32 to vector<8x8x128xf32>
    %43 = arith.mulf %41, %42 : vector<8x8x128xf32>
    %44 = arith.addf %39, %43 : vector<8x8x128xf32>
    %c4_23 = arith.constant 4 : index
    %c0_24 = arith.constant 0 : index
    %c0_25 = arith.constant 0 : index
    %c0_26 = arith.constant 0 : index
    %45 = vector.load %arg1[%c4_23, %c0_24, %c0_25, %c0_26] : memref<8x9x9x128xf32, #tpu.memory_space<vmem>>, vector<1x8x8x128xf32>
    %46 = vector.shape_cast %45 : vector<1x8x8x128xf32> to vector<8x8x128xf32>
    %47 = vector.broadcast %3 : f32 to vector<8x8x128xf32>
    %48 = arith.mulf %46, %47 : vector<8x8x128xf32>
    %49 = arith.addf %44, %48 : vector<8x8x128xf32>
    %c6_27 = arith.constant 6 : index
    %c0_28 = arith.constant 0 : index
    %c0_29 = arith.constant 0 : index
    %c0_30 = arith.constant 0 : index
    %50 = vector.load %arg1[%c6_27, %c0_28, %c0_29, %c0_30] : memref<8x9x9x128xf32, #tpu.memory_space<vmem>>, vector<1x8x8x128xf32>
    %51 = vector.shape_cast %50 : vector<1x8x8x128xf32> to vector<8x8x128xf32>
    %52 = vector.broadcast %4 : f32 to vector<8x8x128xf32>
    %53 = arith.mulf %51, %52 : vector<8x8x128xf32>
    %54 = arith.addf %49, %53 : vector<8x8x128xf32>
    %c4_31 = arith.constant 4 : index
    %c0_32 = arith.constant 0 : index
    %c1_33 = arith.constant 1 : index
    %c0_34 = arith.constant 0 : index
    %55 = vector.load %arg1[%c4_31, %c0_32, %c1_33, %c0_34] : memref<8x9x9x128xf32, #tpu.memory_space<vmem>>, vector<1x8x8x128xf32>
    %56 = vector.shape_cast %55 : vector<1x8x8x128xf32> to vector<8x8x128xf32>
    %57 = vector.broadcast %5 : f32 to vector<8x8x128xf32>
    %58 = arith.mulf %56, %57 : vector<8x8x128xf32>
    %59 = arith.addf %54, %58 : vector<8x8x128xf32>
    %c0_35 = arith.constant 0 : index
    %c1_36 = arith.constant 1 : index
    %c0_37 = arith.constant 0 : index
    %c0_38 = arith.constant 0 : index
    %60 = vector.load %arg1[%c0_35, %c1_36, %c0_37, %c0_38] : memref<8x9x9x128xf32, #tpu.memory_space<vmem>>, vector<1x8x8x128xf32>
    %61 = vector.shape_cast %60 : vector<1x8x8x128xf32> to vector<8x8x128xf32>
    %62 = vector.broadcast %6 : f32 to vector<8x8x128xf32>
    %63 = arith.mulf %61, %62 : vector<8x8x128xf32>
    %64 = arith.addf %59, %63 : vector<8x8x128xf32>
    %c2_39 = arith.constant 2 : index
    %c1_40 = arith.constant 1 : index
    %c0_41 = arith.constant 0 : index
    %c0_42 = arith.constant 0 : index
    %65 = vector.load %arg1[%c2_39, %c1_40, %c0_41, %c0_42] : memref<8x9x9x128xf32, #tpu.memory_space<vmem>>, vector<1x8x8x128xf32>
    %66 = vector.shape_cast %65 : vector<1x8x8x128xf32> to vector<8x8x128xf32>
    %67 = vector.broadcast %7 : f32 to vector<8x8x128xf32>
    %68 = arith.mulf %66, %67 : vector<8x8x128xf32>
    %69 = arith.addf %64, %68 : vector<8x8x128xf32>
    %c0_43 = arith.constant 0 : index
    %c1_44 = arith.constant 1 : index
    %c1_45 = arith.constant 1 : index
    %c0_46 = arith.constant 0 : index
    %70 = vector.load %arg1[%c0_43, %c1_44, %c1_45, %c0_46] : memref<8x9x9x128xf32, #tpu.memory_space<vmem>>, vector<1x8x8x128xf32>
    %71 = vector.shape_cast %70 : vector<1x8x8x128xf32> to vector<8x8x128xf32>
    %72 = vector.broadcast %8 : f32 to vector<8x8x128xf32>
    %73 = arith.mulf %71, %72 : vector<8x8x128xf32>
    %74 = arith.addf %69, %73 : vector<8x8x128xf32>
    %c1_47 = arith.constant 1 : index
    %c0_48 = arith.constant 0 : index
    %c0_49 = arith.constant 0 : index
    %c0_50 = arith.constant 0 : index
    %75 = vector.load %arg1[%c1_47, %c0_48, %c0_49, %c0_50] : memref<8x9x9x128xf32, #tpu.memory_space<vmem>>, vector<1x8x8x128xf32>
    %76 = vector.shape_cast %75 : vector<1x8x8x128xf32> to vector<8x8x128xf32>
    %77 = vector.broadcast %9 : f32 to vector<8x8x128xf32>
    %78 = arith.mulf %76, %77 : vector<8x8x128xf32>
    %79 = arith.addf %74, %78 : vector<8x8x128xf32>
    %c3_51 = arith.constant 3 : index
    %c0_52 = arith.constant 0 : index
    %c0_53 = arith.constant 0 : index
    %c0_54 = arith.constant 0 : index
    %80 = vector.load %arg1[%c3_51, %c0_52, %c0_53, %c0_54] : memref<8x9x9x128xf32, #tpu.memory_space<vmem>>, vector<1x8x8x128xf32>
    %81 = vector.shape_cast %80 : vector<1x8x8x128xf32> to vector<8x8x128xf32>
    %82 = vector.broadcast %10 : f32 to vector<8x8x128xf32>
    %83 = arith.mulf %81, %82 : vector<8x8x128xf32>
    %84 = arith.addf %79, %83 : vector<8x8x128xf32>
    %c1_55 = arith.constant 1 : index
    %c0_56 = arith.constant 0 : index
    %c1_57 = arith.constant 1 : index
    %c0_58 = arith.constant 0 : index
    %85 = vector.load %arg1[%c1_55, %c0_56, %c1_57, %c0_58] : memref<8x9x9x128xf32, #tpu.memory_space<vmem>>, vector<1x8x8x128xf32>
    %86 = vector.shape_cast %85 : vector<1x8x8x128xf32> to vector<8x8x128xf32>
    %87 = vector.broadcast %11 : f32 to vector<8x8x128xf32>
    %88 = arith.mulf %86, %87 : vector<8x8x128xf32>
    %89 = arith.addf %84, %88 : vector<8x8x128xf32>
    %c5_59 = arith.constant 5 : index
    %c0_60 = arith.constant 0 : index
    %c0_61 = arith.constant 0 : index
    %c0_62 = arith.constant 0 : index
    %90 = vector.load %arg1[%c5_59, %c0_60, %c0_61, %c0_62] : memref<8x9x9x128xf32, #tpu.memory_space<vmem>>, vector<1x8x8x128xf32>
    %91 = vector.shape_cast %90 : vector<1x8x8x128xf32> to vector<8x8x128xf32>
    %92 = vector.broadcast %12 : f32 to vector<8x8x128xf32>
    %93 = arith.mulf %91, %92 : vector<8x8x128xf32>
    %94 = arith.addf %89, %93 : vector<8x8x128xf32>
    %c7_63 = arith.constant 7 : index
    %c0_64 = arith.constant 0 : index
    %c0_65 = arith.constant 0 : index
    %c0_66 = arith.constant 0 : index
    %95 = vector.load %arg1[%c7_63, %c0_64, %c0_65, %c0_66] : memref<8x9x9x128xf32, #tpu.memory_space<vmem>>, vector<1x8x8x128xf32>
    %96 = vector.shape_cast %95 : vector<1x8x8x128xf32> to vector<8x8x128xf32>
    %97 = vector.broadcast %13 : f32 to vector<8x8x128xf32>
    %98 = arith.mulf %96, %97 : vector<8x8x128xf32>
    %99 = arith.addf %94, %98 : vector<8x8x128xf32>
    %c5_67 = arith.constant 5 : index
    %c0_68 = arith.constant 0 : index
    %c1_69 = arith.constant 1 : index
    %c0_70 = arith.constant 0 : index
    %100 = vector.load %arg1[%c5_67, %c0_68, %c1_69, %c0_70] : memref<8x9x9x128xf32, #tpu.memory_space<vmem>>, vector<1x8x8x128xf32>
    %101 = vector.shape_cast %100 : vector<1x8x8x128xf32> to vector<8x8x128xf32>
    %102 = vector.broadcast %14 : f32 to vector<8x8x128xf32>
    %103 = arith.mulf %101, %102 : vector<8x8x128xf32>
    %104 = arith.addf %99, %103 : vector<8x8x128xf32>
    %c1_71 = arith.constant 1 : index
    %c1_72 = arith.constant 1 : index
    %c0_73 = arith.constant 0 : index
    %c0_74 = arith.constant 0 : index
    %105 = vector.load %arg1[%c1_71, %c1_72, %c0_73, %c0_74] : memref<8x9x9x128xf32, #tpu.memory_space<vmem>>, vector<1x8x8x128xf32>
    %106 = vector.shape_cast %105 : vector<1x8x8x128xf32> to vector<8x8x128xf32>
    %107 = vector.broadcast %15 : f32 to vector<8x8x128xf32>
    %108 = arith.mulf %106, %107 : vector<8x8x128xf32>
    %109 = arith.addf %104, %108 : vector<8x8x128xf32>
    %c3_75 = arith.constant 3 : index
    %c1_76 = arith.constant 1 : index
    %c0_77 = arith.constant 0 : index
    %c0_78 = arith.constant 0 : index
    %110 = vector.load %arg1[%c3_75, %c1_76, %c0_77, %c0_78] : memref<8x9x9x128xf32, #tpu.memory_space<vmem>>, vector<1x8x8x128xf32>
    %111 = vector.shape_cast %110 : vector<1x8x8x128xf32> to vector<8x8x128xf32>
    %112 = vector.broadcast %16 : f32 to vector<8x8x128xf32>
    %113 = arith.mulf %111, %112 : vector<8x8x128xf32>
    %114 = arith.addf %109, %113 : vector<8x8x128xf32>
    %c1_79 = arith.constant 1 : index
    %c1_80 = arith.constant 1 : index
    %c1_81 = arith.constant 1 : index
    %c0_82 = arith.constant 0 : index
    %115 = vector.load %arg1[%c1_79, %c1_80, %c1_81, %c0_82] : memref<8x9x9x128xf32, #tpu.memory_space<vmem>>, vector<1x8x8x128xf32>
    %116 = vector.shape_cast %115 : vector<1x8x8x128xf32> to vector<8x8x128xf32>
    %117 = vector.broadcast %17 : f32 to vector<8x8x128xf32>
    %118 = arith.mulf %116, %117 : vector<8x8x128xf32>
    %119 = arith.addf %114, %118 : vector<8x8x128xf32>
    %cst = arith.constant 0.000000e+00 : f32
    %120 = vector.broadcast %cst : f32 to vector<8x8x128xf32>
    %121 = arith.cmpf ogt, %119, %120 : vector<8x8x128xf32>
    %cst_83 = arith.constant -1.9890641 : f32
    %122 = vector.broadcast %cst_83 : f32 to vector<8x8x128xf32>
    %123 = arith.mulf %119, %122 : vector<8x8x128xf32>
    %124 = arith.select %121, %119, %123 : vector<8x8x128xi1>, vector<8x8x128xf32>
    %cst_84 = arith.constant 0.000000e+00 : f32
    %125 = vector.broadcast %cst_84 : f32 to vector<1x10x128xf32>
    %cst_85 = arith.constant 0.000000e+00 : f32
    %126 = vector.broadcast %cst_85 : f32 to vector<8x1x128xf32>
    %c0_86 = arith.constant 0 : index
    %c0_87 = arith.constant 0 : index
    %c0_88 = arith.constant 0 : index
    %127 = vector.load %arg7[%c0_86, %c0_87, %c0_88] : memref<10x10x128xf32, #tpu.memory_space<vmem>>, vector<1x10x128xf32>
    tpu.vector_store %arg7[%c0_86, %c0_87, %c0_88], %125 {strides = array<i32>} : memref<10x10x128xf32, #tpu.memory_space<vmem>>, vector<1x10x128xf32>,
    %c9_89 = arith.constant 9 : index
    %c0_90 = arith.constant 0 : index
    %c0_91 = arith.constant 0 : index
    %128 = vector.load %arg7[%c9_89, %c0_90, %c0_91] : memref<10x10x128xf32, #tpu.memory_space<vmem>>, vector<1x10x128xf32>
    tpu.vector_store %arg7[%c9_89, %c0_90, %c0_91], %125 {strides = array<i32>} : memref<10x10x128xf32, #tpu.memory_space<vmem>>, vector<1x10x128xf32>,
    %c1_92 = arith.constant 1 : index
    %c0_93 = arith.constant 0 : index
    %c0_94 = arith.constant 0 : index
    %129 = vector.load %arg7[%c1_92, %c0_93, %c0_94] : memref<10x10x128xf32, #tpu.memory_space<vmem>>, vector<8x1x128xf32>
    tpu.vector_store %arg7[%c1_92, %c0_93, %c0_94], %126 {strides = array<i32>} : memref<10x10x128xf32, #tpu.memory_space<vmem>>, vector<8x1x128xf32>,
    %c1_95 = arith.constant 1 : index
    %c9_96 = arith.constant 9 : index
    %c0_97 = arith.constant 0 : index
    %130 = vector.load %arg7[%c1_95, %c9_96, %c0_97] : memref<10x10x128xf32, #tpu.memory_space<vmem>>, vector<8x1x128xf32>
    tpu.vector_store %arg7[%c1_95, %c9_96, %c0_97], %126 {strides = array<i32>} : memref<10x10x128xf32, #tpu.memory_space<vmem>>, vector<8x1x128xf32>,
    %c1_98 = arith.constant 1 : index
    %c1_99 = arith.constant 1 : index
    %c0_100 = arith.constant 0 : index
    %131 = vector.load %arg7[%c1_98, %c1_99, %c0_100] : memref<10x10x128xf32, #tpu.memory_space<vmem>>, vector<8x8x128xf32>
    tpu.vector_store %arg7[%c1_98, %c1_99, %c0_100], %124 {strides = array<i32>} : memref<10x10x128xf32, #tpu.memory_space<vmem>>, vector<8x8x128xf32>,
    %132 = vector.broadcast %27 : f32 to vector<9x9x128xf32>
    %c0_101 = arith.constant 0 : index
    %c0_102 = arith.constant 0 : index
    %c0_103 = arith.constant 0 : index
    %133 = vector.load %arg7[%c0_101, %c0_102, %c0_103] : memref<10x10x128xf32, #tpu.memory_space<vmem>>, vector<9x9x128xf32>
    %134 = vector.broadcast %19 : f32 to vector<9x9x128xf32>
    %135 = arith.mulf %133, %134 : vector<9x9x128xf32>
    %136 = arith.addf %132, %135 : vector<9x9x128xf32>
    %c0_104 = arith.constant 0 : index
    %c1_105 = arith.constant 1 : index
    %c0_106 = arith.constant 0 : index
    %137 = vector.load %arg7[%c0_104, %c1_105, %c0_106] : memref<10x10x128xf32, #tpu.memory_space<vmem>>, vector<9x9x128xf32>
    %138 = vector.broadcast %20 : f32 to vector<9x9x128xf32>
    %139 = arith.mulf %137, %138 : vector<9x9x128xf32>
    %140 = arith.addf %136, %139 : vector<9x9x128xf32>
    %c1_107 = arith.constant 1 : index
    %c0_108 = arith.constant 0 : index
    %c0_109 = arith.constant 0 : index
    %141 = vector.load %arg7[%c1_107, %c0_108, %c0_109] : memref<10x10x128xf32, #tpu.memory_space<vmem>>, vector<9x9x128xf32>
    %142 = vector.broadcast %21 : f32 to vector<9x9x128xf32>
    %143 = arith.mulf %141, %142 : vector<9x9x128xf32>
    %144 = arith.addf %140, %143 : vector<9x9x128xf32>
    %c1_110 = arith.constant 1 : index
    %c1_111 = arith.constant 1 : index
    %c0_112 = arith.constant 0 : index
    %145 = vector.load %arg7[%c1_110, %c1_111, %c0_112] : memref<10x10x128xf32, #tpu.memory_space<vmem>>, vector<9x9x128xf32>
    %146 = vector.broadcast %22 : f32 to vector<9x9x128xf32>
    %147 = arith.mulf %145, %146 : vector<9x9x128xf32>
    %148 = arith.addf %144, %147 : vector<9x9x128xf32>
    %cst_113 = arith.constant 0.000000e+00 : f32
    %149 = vector.broadcast %cst_113 : f32 to vector<9x9x128xf32>
    %150 = arith.cmpf ogt, %148, %149 : vector<9x9x128xf32>
    %cst_114 = arith.constant -1.9890641 : f32
    %151 = vector.broadcast %cst_114 : f32 to vector<9x9x128xf32>
    %152 = arith.mulf %148, %151 : vector<9x9x128xf32>
    %153 = arith.select %150, %148, %152 : vector<9x9x128xi1>, vector<9x9x128xf32>
    %c0_115 = arith.constant 0 : index
    %c0_116 = arith.constant 0 : index
    %c0_117 = arith.constant 0 : index
    %c0_118 = arith.constant 0 : index
    %154 = vector.load %arg6[%c0_115, %c0_116, %c0_117, %c0_118] : memref<2x9x9x128xf32, #tpu.memory_space<vmem>>, vector<1x9x9x128xf32>
    %155 = vector.shape_cast %154 : vector<1x9x9x128xf32> to vector<9x9x128xf32>
    %156 = vector.shape_cast %153 : vector<9x9x128xf32> to vector<1x9x9x128xf32>
    tpu.vector_store %arg6[%c0_115, %c0_116, %c0_117, %c0_118], %156 {strides = array<i32>} : memref<2x9x9x128xf32, #tpu.memory_space<vmem>>, vector<1x9x9x128xf32>,
    %157 = vector.broadcast %28 : f32 to vector<9x9x128xf32>
    %c0_119 = arith.constant 0 : index
    %c0_120 = arith.constant 0 : index
    %c0_121 = arith.constant 0 : index
    %158 = vector.load %arg7[%c0_119, %c0_120, %c0_121] : memref<10x10x128xf32, #tpu.memory_space<vmem>>, vector<9x9x128xf32>
    %159 = vector.broadcast %23 : f32 to vector<9x9x128xf32>
    %160 = arith.mulf %158, %159 : vector<9x9x128xf32>
    %161 = arith.addf %157, %160 : vector<9x9x128xf32>
    %c0_122 = arith.constant 0 : index
    %c1_123 = arith.constant 1 : index
    %c0_124 = arith.constant 0 : index
    %162 = vector.load %arg7[%c0_122, %c1_123, %c0_124] : memref<10x10x128xf32, #tpu.memory_space<vmem>>, vector<9x9x128xf32>
    %163 = vector.broadcast %24 : f32 to vector<9x9x128xf32>
    %164 = arith.mulf %162, %163 : vector<9x9x128xf32>
    %165 = arith.addf %161, %164 : vector<9x9x128xf32>
    %c1_125 = arith.constant 1 : index
    %c0_126 = arith.constant 0 : index
    %c0_127 = arith.constant 0 : index
    %166 = vector.load %arg7[%c1_125, %c0_126, %c0_127] : memref<10x10x128xf32, #tpu.memory_space<vmem>>, vector<9x9x128xf32>
    %167 = vector.broadcast %25 : f32 to vector<9x9x128xf32>
    %168 = arith.mulf %166, %167 : vector<9x9x128xf32>
    %169 = arith.addf %165, %168 : vector<9x9x128xf32>
    %c1_128 = arith.constant 1 : index
    %c1_129 = arith.constant 1 : index
    %c0_130 = arith.constant 0 : index
    %170 = vector.load %arg7[%c1_128, %c1_129, %c0_130] : memref<10x10x128xf32, #tpu.memory_space<vmem>>, vector<9x9x128xf32>
    %171 = vector.broadcast %26 : f32 to vector<9x9x128xf32>
    %172 = arith.mulf %170, %171 : vector<9x9x128xf32>
    %173 = arith.addf %169, %172 : vector<9x9x128xf32>
    %cst_131 = arith.constant 0.000000e+00 : f32
    %174 = vector.broadcast %cst_131 : f32 to vector<9x9x128xf32>
    %175 = arith.cmpf ogt, %173, %174 : vector<9x9x128xf32>
    %cst_132 = arith.constant -1.9890641 : f32
    %176 = vector.broadcast %cst_132 : f32 to vector<9x9x128xf32>
    %177 = arith.mulf %173, %176 : vector<9x9x128xf32>
    %178 = arith.select %175, %173, %177 : vector<9x9x128xi1>, vector<9x9x128xf32>
    %c1_133 = arith.constant 1 : index
    %c0_134 = arith.constant 0 : index
    %c0_135 = arith.constant 0 : index
    %c0_136 = arith.constant 0 : index
    %179 = vector.load %arg6[%c1_133, %c0_134, %c0_135, %c0_136] : memref<2x9x9x128xf32, #tpu.memory_space<vmem>>, vector<1x9x9x128xf32>
    %180 = vector.shape_cast %179 : vector<1x9x9x128xf32> to vector<9x9x128xf32>
    %181 = vector.shape_cast %178 : vector<9x9x128xf32> to vector<1x9x9x128xf32>
    tpu.vector_store %arg6[%c1_133, %c0_134, %c0_135, %c0_136], %181 {strides = array<i32>} : memref<2x9x9x128xf32, #tpu.memory_space<vmem>>, vector<1x9x9x128xf32>,
    return
  }
  func.func @transform_0(%arg0: i32) -> (i32, i32, i32, i32) {
    %c0_i32 = arith.constant 0 : i32
    %c0_i32_0 = arith.constant 0 : i32
    %c0_i32_1 = arith.constant 0 : i32
    %c0_i32_2 = arith.constant 0 : i32
    return %c0_i32, %c0_i32_0, %c0_i32_1, %arg0 : i32, i32, i32, i32
  }
  func.func @transform_1(%arg0: i32) -> i32 {
    %c0_i32 = arith.constant 0 : i32
    %c0_i32_0 = arith.constant 0 : i32
    return %c0_i32 : i32
  }
  func.func @transform_2(%arg0: i32) -> i32 {
    %c0_i32 = arith.constant 0 : i32
    %c0_i32_0 = arith.constant 0 : i32
    return %c0_i32 : i32
  }
  func.func @transform_3(%arg0: i32) -> i32 {
    %c0_i32 = arith.constant 0 : i32
    %c0_i32_0 = arith.constant 0 : i32
    return %c0_i32 : i32
  }
  func.func @transform_4(%arg0: i32) -> i32 {
    %c0_i32 = arith.constant 0 : i32
    %c0_i32_0 = arith.constant 0 : i32
    return %c0_i32 : i32
  }
  func.func @transform_5(%arg0: i32) -> (i32, i32, i32, i32) {
    %c0_i32 = arith.constant 0 : i32
    %c0_i32_0 = arith.constant 0 : i32
    %c0_i32_1 = arith.constant 0 : i32
    %c0_i32_2 = arith.constant 0 : i32
    return %c0_i32, %c0_i32_0, %c0_i32_1, %arg0 : i32, i32, i32, i32
  }
}

</mosaic_0001>

<bundles_post_ra>
// kernel: tpu_custom_call.1
= control target key start
LH: loop header
LB: loop body
LE: loop exit
PB: predicated region body
PF: predicated region fallthrough
CT: control target
= control target key end

     0   :  { %11 = vsyncpa [#allocation5], 0  ;;  %s2700_s0 = inlined_call_operand.vmem [shape: f32[8,9,9,128], index: 0, kind: input, shape index: {}]   ;;  %s2701_s1 = inlined_call_operand.vmem [shape: f32[18], index: 1, kind: input, shape index: {}]   ;;  %s2702_s2 = inlined_call_operand.<no memory space> [shape: f32[1], index: 2, kind: input, shape index: {}]   ;;  %s2703_s3 = inlined_call_operand.vmem [shape: f32[8], index: 3, kind: input, shape index: {}]   ;;  %s2704_s4 = inlined_call_operand.vmem [shape: f32[2], index: 4, kind: input, shape index: {}]   ;;  %s2705_s5 = inlined_call_operand.vmem [shape: f32[2,9,9,128], index: 5, kind: output, shape index: {}]  }
   0x1   :  { %12 = vsyncpa [#allocation7], 0  ;;  %s33_s20 = sshll.u32 %s2703_s3, 4  ;;  %s21_s23 = sshll.u32 %s2701_s1, 4  ;;  %s34_s20 = int_to_ptr.vmem [resolvable:$true] %s33_s20  ;;  %s22_s23 = int_to_ptr.vmem [resolvable:$true] %s21_s23 }
   0x2   :  { %s1371_s24 = scalar_lea.vmem %s34_s20, 16  ;;  %p1376_p1 = scmp.lt.s32.totalorder %s34_s20, %s34_s20 }
   0x3   :  { %p1372_p0 = scmp.ne.s32.totalorder %s34_s20, %s1371_s24  ;;  %p1377_p2 = scmp.lt.s32.totalorder %s1371_s24, %s1371_s24 }
   0x5   :  { %p1378_p3 = por %p1377_p2, %p1376_p1 }
   0x7   :  { %p1379_p4 = pnand %p1378_p3, %p1372_p0 }
   0x9   :  { %1382 = shalt.err (!%p1379_p4)
}
   0xa   :  { %s1411_s25 = smov [#allocation6]   ;;  %s1383_s26 = scalar_lea.vmem %s22_s23, 16 }
   0xb   :  { %36 = dma.vmem_to_smem %s34_s20, 16, %s1411_s25, [#allocation7]  }
   0xc   :  { %p1384_p5 = scmp.ne.s32.totalorder %s22_s23, %s1383_s26  ;;  %p1388_p6 = scmp.lt.s32.totalorder %s22_s23, %s22_s23 }
   0xd   :  { %p1389_p7 = scmp.lt.s32.totalorder %s1383_s26, %s1383_s26 }
   0xf   :  { %p1390_p8 = por %p1389_p7, %p1388_p6 }
  0x11   :  { %p1391_p9 = pnand %p1390_p8, %p1384_p5 }
  0x13   :  { %1394 = shalt.err (!%p1391_p9)
}
  0x14   :  { %s1412_s3 = smov [#allocation4]   ;;  %s43_s28 = sshll.u32 %s2704_s4, 4  ;;  %s44_s28 = int_to_ptr.vmem [resolvable:$true] %s43_s28 }
  0x15   :  { %24 = dma.vmem_to_smem %s22_s23, 16, %s1412_s3, [#allocation5]  }
  0x16   :  { %s1395_s29 = scalar_lea.vmem %s44_s28, 16  ;;  %p1400_p11 = scmp.lt.s32.totalorder %s44_s28, %s44_s28 }
  0x17   :  { %p1396_p10 = scmp.ne.s32.totalorder %s44_s28, %s1395_s29  ;;  %p1401_p12 = scmp.lt.s32.totalorder %s1395_s29, %s1395_s29 }
  0x19   :  { %p1402_p13 = por %p1401_p12, %p1400_p11 }
  0x1b   :  { %p1403_p0 = pnand %p1402_p13, %p1396_p10 }
  0x1d   :  { %1406 = shalt.err (!%p1403_p0)
}
  0x1e   :  { %s1413_s30 = smov [#allocation8]  }
  0x1f   :  { %46 = dma.vmem_to_smem %s44_s28, 16, %s1413_s30, [#allocation7]  }
  0x20   :  { %1407 = dma.done.wait [#allocation5], 16  }
  0x21   :  { %1408 = vsyncadd [#allocation5], 4294967280 }
  0x22   :  { %1409 = dma.done.wait [#allocation7], 32  }
  0x23   :  { %1410 = vsyncadd [#allocation7], 4294967264 }
  0x24   :  { %56 = sfence }
  0x25   :  { %s1454_s6 = sld [smem:[#allocation4]]  ;;  %s1456_s7 = sld [smem:[#allocation4 + $0x1]]  ;;  %v1414_v0 = vmov 0.0   ;;  %v87_v1 = vld [vmem:[%s2700_s0] sm:$0xff]  ;;  %v1479_v3 = vstv %s2702_s2  ;;  %v1252_v14 = vld [vmem:[%s2700_s0 + $0x10] sm:$0xff] }
  0x26   :  { %572 = vst [vmem:[#allocation2] sm:$0xff] %v1414_v0  ;;  %573 = vst [vmem:[#allocation2 + $0x8] sm:$0x3] %v1414_v0  ;;  %s1196_s4 = sld [smem:[#allocation4 + $0x2]]  ;;  %s1197_s8 = sld [smem:[#allocation4 + $0x3]]  ;;  %v1220_v2 = vld [vmem:[%s2700_s0 + $0x120] sm:$0xff] }
  0x27   :  { %575 = vst [vmem:[#allocation2 + $0x90] sm:$0xff] %v1414_v0  ;;  %576 = vst [vmem:[#allocation2 + $0x98] sm:$0x3] %v1414_v0  ;;  %s1198_s9 = sld [smem:[#allocation4 + $0x4]]  ;;  %s1199_s10 = sld [smem:[#allocation4 + $0x5]]  ;;  %v138_v4 = vld [vmem:[%s2700_s0 + $0x1] sm:$0xff] }
  0x28   :  { %578 = vst [vmem:[#allocation2 + $0x10] sm:$0x1] %v1414_v0  ;;  %579 = vst [vmem:[#allocation2 + $0x20] sm:$0x1] %v1414_v0  ;;  %s1458_s11 = sld [smem:[#allocation4 + $0x6]]  ;;  %s1460_s12 = sld [smem:[#allocation4 + $0x7]] }
  0x29   :  { %580 = vst [vmem:[#allocation2 + $0x30] sm:$0x1] %v1414_v0  ;;  %581 = vst [vmem:[#allocation2 + $0x40] sm:$0x1] %v1414_v0  ;;  %s1462_s13 = sld [smem:[#allocation4 + $0x8]]  ;;  %s1464_s14 = sld [smem:[#allocation4 + $0x9]] }
  0x2a   :  { %582 = vst [vmem:[#allocation2 + $0x50] sm:$0x1] %v1414_v0  ;;  %583 = vst [vmem:[#allocation2 + $0x60] sm:$0x1] %v1414_v0  ;;  %s1472_s19 = sld [smem:[#allocation4 + $0xa]]  ;;  %s1474_s20 = sld [smem:[#allocation4 + $0xb]] }
  0x2b   :  { %584 = vst [vmem:[#allocation2 + $0x70] sm:$0x1] %v1414_v0  ;;  %585 = vst [vmem:[#allocation2 + $0x80] sm:$0x1] %v1414_v0  ;;  %v1228_v5 = vld [vmem:[%s2700_s0 + $0x240] sm:$0xff]  ;;  %s1487_s3 = sld [smem:[#allocation4 + $0xc]]  ;;  %v1492_v6 = vstv %s1454_s6  ;;  %v1495_v7 = vstv %s1456_s7 }
  0x2c   :  { %586 = vst [vmem:[#allocation2 + $0x19] sm:$0x1] %v1414_v0  ;;  %587 = vst [vmem:[#allocation2 + $0x29] sm:$0x1] %v1414_v0  ;;  %s1489_s1 = sld [smem:[#allocation4 + $0xd]]  ;;  %v1236_v8 = vld [vmem:[%s2700_s0 + $0x360] sm:$0xff]  ;;  %v96_v10 = vmul.f32 %v1492_v6, %v87_v1  ;;  %v122_v11 = vmul.f32 %v1220_v2, %v1495_v7  ;;  %v1509_v12 = vstv %s1196_s4  ;;  %v1511_v13 = vstv %s1197_s8 }
  0x2d   :  { %588 = vst [vmem:[#allocation2 + $0x39] sm:$0x1] %v1414_v0  ;;  %589 = vst [vmem:[#allocation2 + $0x49] sm:$0x1] %v1414_v0  ;;  %v1244_v9 = vld [vmem:[%s2700_s0 + $0x241] sm:$0xff]  ;;  %s1503_s30 = sld [smem:[#allocation4 + $0xe]]  ;;  %v147_v15 = vmul.f32 %v1509_v12, %v138_v4  ;;  %v173_v16 = vmul.f32 %v1228_v5, %v1511_v13  ;;  %v1522_v17 = vstv %s1198_s9  ;;  %v1524_v18 = vstv %s1199_s10 }
  0x2e   :  { %590 = vst [vmem:[#allocation2 + $0x59] sm:$0x1] %v1414_v0  ;;  %591 = vst [vmem:[#allocation2 + $0x69] sm:$0x1] %v1414_v0  ;;  %s1505_s15 = sld [smem:[#allocation4 + $0xf]]  ;;  %s1516_s16 = sld [smem:[#allocation4 + $0x10]]  ;;  %v104_v21 = vadd.f32 %v96_v10, %v1479_v3  ;;  %v199_v22 = vmul.f32 %v1236_v8, %v1522_v17  ;;  %v224_v23 = vmul.f32 %v1244_v9, %v1524_v18  ;;  %v1536_v24 = vstv %s1458_s11 }
  0x2f   :  { %592 = vst [vmem:[#allocation2 + $0x79] sm:$0x1] %v1414_v0  ;;  %593 = vst [vmem:[#allocation2 + $0x89] sm:$0x1] %v1414_v0  ;;  %s1518_s17 = sld [smem:[#allocation4 + $0x11]]  ;;  %v1260_v19 = vld [vmem:[%s2700_s0 + $0x130] sm:$0xff]  ;;  %v1548_v28 = vmul.f32 %v1252_v14, %v1536_v24  ;;  %v1551_v29 = vstv %s1460_s12  ;;  %v1554_v30 = vstv %s1462_s13  ;;  %v1557_v31 = vstv %s1464_s14 }
  0x30   :  { %v1276_v20 = vld [vmem:[%s2700_s0 + $0x90] sm:$0xff]  ;;  %v130_v33 = vadd.f32 %v122_v11, %v104_v21  ;;  %v1563_v34 = vmul.f32 %v1260_v19, %v1551_v29  ;;  %v1578_v39 = vstv %s1472_s19  ;;  %v1581_v40 = vstv %s1474_s20  ;;  %v1324_v47 = vld [vmem:[%s2700_s0 + $0xa0] sm:$0xff]  ;;  %s2185_s9 = sld [smem:[#allocation6]]  ;;  %s2191_s10 = sld [smem:[#allocation6 + $0x1]] }
  0x31   :  { %v1268_v25 = vld [vmem:[%s2700_s0 + $0x11] sm:$0xff]  ;;  %v1569_v36 = vmul.f32 %v1276_v20, %v1557_v31  ;;  %v1584_v41 = vstv %s1487_s3  ;;  %v1332_v48 = vld [vmem:[%s2700_s0 + $0x1c0] sm:$0xff]  ;;  %v97_v62 = vmul.f32 %v1252_v14, %v1492_v6  ;;  %v123_v63 = vmul.f32 %v1260_v19, %v1495_v7  ;;  %s2193_s22 = sld [smem:[#allocation8]]  ;;  %s2211_s25 = sld [smem:[#allocation6 + $0x2]] }
  0x32   :  { %v1284_v26 = vld [vmem:[%s2700_s0 + $0x1b0] sm:$0xff]  ;;  %v1566_v35 = vmul.f32 %v1268_v25, %v1554_v30  ;;  %v1587_v42 = vstv %s1489_s1  ;;  %v155_v43 = vadd.f32 %v147_v15, %v130_v33  ;;  %v1340_v60 = vld [vmem:[%s2700_s0 + $0xa1] sm:$0xff]  ;;  %v148_v0 = vmul.f32 %v1268_v25, %v1509_v12  ;;  %s2213_s11 = sld [smem:[#allocation6 + $0x3]]  ;;  %s2257_s2 = sld [smem:[#allocation8 + $0x1]] }
  0x33   :  { %v1292_v27 = vld [vmem:[%s2700_s0 + $0x91] sm:$0xff]  ;;  %v1590_v44 = vmul.f32 %v1284_v26, %v1578_v39  ;;  %v1611_v51 = vstv %s1503_s30  ;;  %v1253_v1 = vld [vmem:[%s2700_s0 + $0x20] sm:$0xff]  ;;  %v105_v14 = vadd.f32 %v97_v62, %v1479_v3  ;;  %v1678_v26 = vmul.f32 %v1324_v47, %v1557_v31  ;;  %s2279_s29 = sld [smem:[#allocation6 + $0x5]]  ;;  %s2294_s6 = sld [smem:[#allocation6 + $0x6]] }
  0x34   :  { %v1300_v32 = vld [vmem:[%s2700_s0 + $0x2d0] sm:$0xff]  ;;  %v1593_v45 = vmul.f32 %v1292_v27, %v1581_v40  ;;  %v1614_v52 = vstv %s1505_s15  ;;  %v1617_v53 = vstv %s1516_s16  ;;  %v181_v55 = vadd.f32 %v173_v16, %v155_v43  ;;  %v1261_v9 = vld [vmem:[%s2700_s0 + $0x140] sm:$0xff]  ;;  %s2308_s30 = sld [smem:[#allocation6 + $0x7]] }
  0x35   :  { %v1308_v37 = vld [vmem:[%s2700_s0 + $0x3f0] sm:$0xff]  ;;  %v1596_v46 = vmul.f32 %v1300_v32, %v1584_v41  ;;  %v1626_v57 = vmul.f32 %v1324_v47, %v1614_v52  ;;  %v1629_v58 = vmul.f32 %v1332_v48, %v1617_v53  ;;  %v1638_v61 = vstv %s1518_s17  ;;  %v1301_v10 = vld [vmem:[%s2700_s0 + $0x2e0] sm:$0xff] }
  0x36   :  { %v1316_v38 = vld [vmem:[%s2700_s0 + $0x2d1] sm:$0xff]  ;;  %v1608_v50 = vmul.f32 %v1308_v37, %v1587_v42  ;;  %v207_v2 = vadd.f32 %v199_v22, %v181_v55  ;;  %v1647_v4 = vmul.f32 %v1340_v60, %v1638_v61  ;;  %v1309_v11 = vld [vmem:[%s2700_s0 + $0x400] sm:$0xff]  ;;  %v1663_v16 = vmul.f32 %v1253_v1, %v1536_v24 }
  0x37   :  { %v1229_v49 = vld [vmem:[%s2700_s0 + $0x250] sm:$0xff]  ;;  %v1623_v56 = vmul.f32 %v1316_v38, %v1611_v51  ;;  %v1666_v19 = vmul.f32 %v1261_v9, %v1551_v29  ;;  %v1269_v20 = vld [vmem:[%s2700_s0 + $0x21] sm:$0xff]  ;;  %v1681_v27 = vmul.f32 %v1332_v48, %v1578_v39  ;;  %v131_v33 = vadd.f32 %v123_v63, %v105_v14 }
  0x38   :  { %v1237_v54 = vld [vmem:[%s2700_s0 + $0x370] sm:$0xff]  ;;  %2712 = vst [vmem:[#allocation11_spill] sm:$0xff] %v1647_v4  ;;  %v174_v5 = vmul.f32 %v1229_v49, %v1511_v13  ;;  %v1317_v21 = vld [vmem:[%s2700_s0 + $0x2e1] sm:$0xff]  ;;  %v232_v22 = vadd.f32 %v224_v23, %v207_v2  ;;  %v1675_v25 = vmul.f32 %v1269_v20, %v1554_v30  ;;  %v1687_v37 = vmul.f32 %v1340_v60, %v1581_v40 }
  0x39   :  { %v1245_v59 = vld [vmem:[%s2700_s0 + $0x251] sm:$0xff]  ;;  %v200_v8 = vmul.f32 %v1237_v54, %v1522_v17  ;;  %v1690_v38 = vmul.f32 %v1301_v10, %v1584_v41  ;;  %v1693_v23 = vmul.f32 %v1309_v11, %v1587_v42  ;;  %v1230_v47 = vld [vmem:[%s2700_s0 + $0x260] sm:$0xff]  ;;  %v1706_v54 = vmul.f32 %v1317_v21, %v1611_v51 }
  0x3a   :  { %v225_v15 = vmul.f32 %v1245_v59, %v1524_v18  ;;  %v1325_v32 = vld [vmem:[%s2700_s0 + $0xb0] sm:$0xff]  ;;  %v1238_v48 = vld [vmem:[%s2700_s0 + $0x380] sm:$0xff]  ;;  %v258_v49 = vadd.f32 %v1548_v28, %v232_v22  ;;  %v156_v63 = vadd.f32 %v148_v0, %v131_v33  ;;  %v98_v2 = vmul.f32 %v1253_v1, %v1492_v6 }
  0x3b   :  { %2713 = vst [vmem:[#allocation12_spill] sm:$0xff] %v1690_v38  ;;  %2714 = vst [vmem:[#allocation13_spill] sm:$0xff] %v1693_v23  ;;  %v1333_v43 = vld [vmem:[%s2700_s0 + $0x1d0] sm:$0xff]  ;;  %v1709_v55 = vmul.f32 %v1325_v32, %v1614_v52  ;;  %v1246_v62 = vld [vmem:[%s2700_s0 + $0x261] sm:$0xff]  ;;  %v124_v10 = vmul.f32 %v1261_v9, %v1495_v7  ;;  %v149_v14 = vmul.f32 %v1269_v20, %v1509_v12 }
  0x3c   :  { %2715 = vst [vmem:[#allocation14_spill] sm:$0xff] %v1706_v54  ;;  %v1712_v59 = vmul.f32 %v1333_v43, %v1617_v53  ;;  %v1341_v60 = vld [vmem:[%s2700_s0 + $0xb1] sm:$0xff]  ;;  %v284_v11 = vadd.f32 %v1563_v34, %v258_v49  ;;  %v175_v21 = vmul.f32 %v1230_v47, %v1511_v13  ;;  %v201_v22 = vmul.f32 %v1238_v48, %v1522_v17 }
  0x3d   :  { %2716 = vst [vmem:[#allocation15_spill] sm:$0xff] %v1709_v55  ;;  %v1721_v28 = vmul.f32 %v1341_v60, %v1638_v61  ;;  %v1262_v0 = vld [vmem:[%s2700_s0 + $0x150] sm:$0xff]  ;;  %v182_v9 = vadd.f32 %v174_v5, %v156_v63  ;;  %v106_v34 = vadd.f32 %v98_v2, %v1479_v3  ;;  %v226_v20 = vmul.f32 %v1246_v62, %v1524_v18 }
  0x3e   :  { %2717 = vst [vmem:[#allocation16_spill] sm:$0xff] %v1712_v59  ;;  %v1254_v59 = vld [vmem:[%s2700_s0 + $0x30] sm:$0xff]  ;;  %v309_v5 = vadd.f32 %v1566_v35, %v284_v11  ;;  %v1752_v63 = vmul.f32 %v1262_v0, %v1551_v29  ;;  %v1758_v2 = vmul.f32 %v1325_v32, %v1557_v31  ;;  %v1761_v54 = vmul.f32 %v1333_v43, %v1578_v39  ;;  %v1334_v32 = vld [vmem:[%s2700_s0 + $0x1e0] sm:$0xff] }
  0x3f   :  { %2718 = vst [vmem:[#allocation17_spill] sm:$0xff] %v1721_v28  ;;  %v1270_v1 = vld [vmem:[%s2700_s0 + $0x31] sm:$0xff]  ;;  %v252_v33 = vmul.f32 %v1254_v59, %v1536_v24  ;;  %v208_v28 = vadd.f32 %v200_v8, %v182_v9  ;;  %v132_v55 = vadd.f32 %v124_v10, %v106_v34  ;;  %v1764_v23 = vmul.f32 %v1341_v60, %v1581_v40  ;;  %v1326_v8 = vld [vmem:[%s2700_s0 + $0xc0] sm:$0xff] }
  0x40   :  { %v1302_v47 = vld [vmem:[%s2700_s0 + $0x2f0] sm:$0xff]  ;;  %v1755_v62 = vmul.f32 %v1270_v1, %v1554_v30  ;;  %v335_v4 = vadd.f32 %v1569_v36, %v309_v5  ;;  %v1786_v10 = vmul.f32 %v1326_v8, %v1614_v52  ;;  %v1789_v9 = vmul.f32 %v1334_v32, %v1617_v53  ;;  %v1342_v34 = vld [vmem:[%s2700_s0 + $0xc1] sm:$0xff] }
  0x41   :  { %v1310_v48 = vld [vmem:[%s2700_s0 + $0x410] sm:$0xff]  ;;  %v1768_v35 = vmul.f32 %v1302_v47, %v1584_v41  ;;  %v233_v43 = vadd.f32 %v225_v15, %v208_v28  ;;  %v157_v60 = vadd.f32 %v149_v14, %v132_v55  ;;  %v1802_v55 = vmul.f32 %v1342_v34, %v1638_v61 }
  0x42   :  { %v1318_v49 = vld [vmem:[%s2700_s0 + $0x2f1] sm:$0xff]  ;;  %v1771_v11 = vmul.f32 %v1310_v48, %v1587_v42  ;;  %2721 = vst [vmem:[#allocation20_spill] sm:$0xff] %v1786_v10  ;;  %2722 = vst [vmem:[#allocation21_spill] sm:$0xff] %v1789_v9  ;;  %v361_v15 = vadd.f32 %v1590_v44, %v335_v4  ;;  %v99_v28 = vmul.f32 %v1254_v59, %v1492_v6  ;;  %v1255_v59 = vld [vmem:[%s2700_s0 + $0x40] sm:$0xff] }
  0x43   :  { %v1774_v38 = vmul.f32 %v1318_v49, %v1611_v51  ;;  %v1231_v36 = vld [vmem:[%s2700_s0 + $0x270] sm:$0xff]  ;;  %2723 = vst [vmem:[#allocation22_spill] sm:$0xff] %v1802_v55  ;;  %v125_v14 = vmul.f32 %v1262_v0, %v1495_v7  ;;  %v259_v49 = vadd.f32 %v1663_v16, %v233_v43  ;;  %v183_v5 = vadd.f32 %v175_v21, %v157_v60  ;;  %v1263_v16 = vld [vmem:[%s2700_s0 + $0x160] sm:$0xff] }
  0x44   :  { %2719 = vst [vmem:[#allocation18_spill] sm:$0xff] %v1771_v11  ;;  %v1239_v47 = vld [vmem:[%s2700_s0 + $0x390] sm:$0xff]  ;;  %v150_v9 = vmul.f32 %v1270_v1, %v1509_v12  ;;  %v176_v10 = vmul.f32 %v1231_v36, %v1511_v13  ;;  %v107_v11 = vadd.f32 %v99_v28, %v1479_v3  ;;  %v253_v1 = vmul.f32 %v1255_v59, %v1536_v24  ;;  %v1271_v36 = vld [vmem:[%s2700_s0 + $0x41] sm:$0xff] }
  0x45   :  { %2720 = vst [vmem:[#allocation19_spill] sm:$0xff] %v1774_v38  ;;  %v1247_v48 = vld [vmem:[%s2700_s0 + $0x271] sm:$0xff]  ;;  %v386_v38 = vadd.f32 %v1593_v45, %v361_v15  ;;  %v202_v44 = vmul.f32 %v1239_v47, %v1522_v17  ;;  %v285_v21 = vadd.f32 %v1666_v19, %v259_v49  ;;  %v209_v0 = vadd.f32 %v201_v22, %v183_v5  ;;  %v1303_v43 = vld [vmem:[%s2700_s0 + $0x300] sm:$0xff] }
  0x46   :  { %v227_v4 = vmul.f32 %v1247_v48, %v1524_v18  ;;  %v1822_v45 = vmul.f32 %v1263_v16, %v1551_v29  ;;  %v1311_v60 = vld [vmem:[%s2700_s0 + $0x420] sm:$0xff]  ;;  %v133_v22 = vadd.f32 %v125_v14, %v107_v11  ;;  %v1835_v47 = vmul.f32 %v1271_v36, %v1554_v30 }
  0x47   :  { %v412_v19 = vadd.f32 %v1596_v46, %v386_v38  ;;  %v1838_v48 = vmul.f32 %v1326_v8, %v1557_v31  ;;  %v1319_v15 = vld [vmem:[%s2700_s0 + $0x301] sm:$0xff]  ;;  %v310_v28 = vadd.f32 %v1675_v25, %v285_v21  ;;  %v234_v49 = vadd.f32 %v226_v20, %v209_v0  ;;  %v1327_v25 = vld [vmem:[%s2700_s0 + $0xd0] sm:$0xff] }
  0x48   :  { %v1845_v5 = vmul.f32 %v1334_v32, %v1578_v39  ;;  %v1848_v55 = vmul.f32 %v1342_v34, %v1581_v40  ;;  %v158_v38 = vadd.f32 %v150_v9, %v133_v22  ;;  %v1852_v11 = vmul.f32 %v1303_v43, %v1584_v41  ;;  %v1343_v9 = vld [vmem:[%s2700_s0 + $0xd1] sm:$0xff]  ;;  %v1232_v21 = vld [vmem:[%s2700_s0 + $0x280] sm:$0xff] }
  0x49   :  { %v438_v46 = vadd.f32 %v1608_v50, %v412_v19  ;;  %v1855_v8 = vmul.f32 %v1311_v60, %v1587_v42  ;;  %v336_v20 = vadd.f32 %v1678_v26, %v310_v28  ;;  %v260_v32 = vadd.f32 %v252_v33, %v234_v49  ;;  %v1335_v50 = vld [vmem:[%s2700_s0 + $0x1f0] sm:$0xff]  ;;  %v1240_v60 = vld [vmem:[%s2700_s0 + $0x3a0] sm:$0xff] }
  0x4a   :  { %v1862_v14 = vmul.f32 %v1319_v15, %v1611_v51  ;;  %v1865_v34 = vmul.f32 %v1327_v25, %v1614_v52  ;;  %v184_v33 = vadd.f32 %v176_v10, %v158_v38  ;;  %v1878_v0 = vmul.f32 %v1335_v50, %v1617_v53 }
  0x4b   :  { %v463_v26 = vadd.f32 %v1623_v56, %v438_v46  ;;  %v1881_v43 = vmul.f32 %v1343_v9, %v1638_v61  ;;  %v362_v19 = vadd.f32 %v1681_v27, %v336_v20  ;;  %v286_v22 = vadd.f32 %v1752_v63, %v260_v32  ;;  %v1248_v56 = vld [vmem:[%s2700_s0 + $0x281] sm:$0xff] }
  0x4c   :  { %v100_v15 = vmul.f32 %v1255_v59, %v1492_v6  ;;  %v126_v28 = vmul.f32 %v1263_v16, %v1495_v7  ;;  %v210_v49 = vadd.f32 %v202_v44, %v184_v33  ;;  %v151_v46 = vmul.f32 %v1271_v36, %v1509_v12  ;;  %v1256_v16 = vld [vmem:[%s2700_s0 + $0x50] sm:$0xff] }
  0x4d   :  { %2724 = vst [vmem:[#allocation23_spill] sm:$0xff] %v1881_v43  ;;  %v489_v10 = vadd.f32 %v1626_v57, %v463_v26  ;;  %v177_v38 = vmul.f32 %v1232_v21, %v1511_v13  ;;  %v387_v43 = vadd.f32 %v1687_v37, %v362_v19  ;;  %v311_v27 = vadd.f32 %v1755_v62, %v286_v22  ;;  %v1264_v37 = vld [vmem:[%s2700_s0 + $0x170] sm:$0xff]  ;;  %v2725_v62 = vld [vmem:[#allocation12_spill] sm:$0xff] }
  0x4e   :  { %v108_v63 = vadd.f32 %v100_v15, %v1479_v3  ;;  %v203_v59 = vmul.f32 %v1240_v60, %v1522_v17  ;;  %v235_v57 = vadd.f32 %v227_v4, %v210_v49  ;;  %v228_v44 = vmul.f32 %v1248_v56, %v1524_v18  ;;  %v2726_v4 = vld [vmem:[#allocation11_spill] sm:$0xff] }
  0x4f   :  { %v515_v20 = vadd.f32 %v1629_v58, %v489_v10  ;;  %v254_v36 = vmul.f32 %v1256_v16, %v1536_v24  ;;  %v413_v32 = vadd.f32 %v2725_v62, %v387_v43  ;;  %v337_v21 = vadd.f32 %v1758_v2, %v311_v27  ;;  %v1272_v58 = vld [vmem:[%s2700_s0 + $0x51] sm:$0xff] }
  0x50   :  { %v134_v26 = vadd.f32 %v126_v28, %v108_v63  ;;  %v280_v33 = vmul.f32 %v1264_v37, %v1551_v29  ;;  %v261_v19 = vadd.f32 %v253_v1, %v235_v57  ;;  %v1917_v22 = vmul.f32 %v1272_v58, %v1554_v30  ;;  %v1304_v2 = vld [vmem:[%s2700_s0 + $0x310] sm:$0xff] }
  0x51   :  { %v540_v60 = vadd.f32 %v2726_v4, %v515_v20  ;;  %v1920_v15 = vmul.f32 %v1327_v25, %v1557_v31  ;;  %v2727_v43 = vld [vmem:[#allocation13_spill] sm:$0xff]  ;;  %v363_v56 = vadd.f32 %v1761_v54, %v337_v21  ;;  %v1928_v49 = vmul.f32 %v1335_v50, %v1578_v39  ;;  %v2728_v54 = vld [vmem:[#allocation14_spill] sm:$0xff] }
  0x52   :  { %v439_v28 = vadd.f32 %v2727_v43, %v413_v32  ;;  %v159_v10 = vadd.f32 %v151_v46, %v134_v26  ;;  %v1312_v1 = vld [vmem:[%s2700_s0 + $0x430] sm:$0xff]  ;;  %v287_v63 = vadd.f32 %v1822_v45, %v261_v19  ;;  %v1938_v20 = vmul.f32 %v1343_v9, %v1581_v40  ;;  %v1328_v9 = vld [vmem:[%s2700_s0 + $0xe0] sm:$0xff] }
  0x53   :  { %v1320_v25 = vld [vmem:[%s2700_s0 + $0x311] sm:$0xff]  ;;  %vm548_vm0 = vcmp.gt.f32.partialorder %v540_v60, 0.0  ;;  %v556_v27 = vmul.f32 -1.9890641, %v540_v60  ;;  %v388_v50 = vadd.f32 %v1764_v23, %v363_v56  ;;  %v1943_v62 = vmul.f32 %v1304_v2, %v1584_v41  ;;  %v2730_v23 = vld [vmem:[#allocation15_spill] sm:$0xff] }
  0x54   :  { %v464_v46 = vadd.f32 %v2728_v54, %v439_v28  ;;  %v185_v57 = vadd.f32 %v177_v38, %v159_v10  ;;  %v312_v21 = vadd.f32 %v1835_v47, %v287_v63  ;;  %v1949_v26 = vmul.f32 %v1312_v1, %v1587_v42  ;;  %v1336_v47 = vld [vmem:[%s2700_s0 + $0x200] sm:$0xff]  ;;  %v1233_v43 = vld [vmem:[%s2700_s0 + $0x290] sm:$0xff]  ;;  %v2731_v1 = vld [vmem:[#allocation16_spill] sm:$0xff] }
  0x55   :  { %v1945_v32 = vsel %vm548_vm0, %v540_v60, %v556_v27  ;;  %v1952_v45 = vmul.f32 %v1320_v25, %v1611_v51  ;;  %v414_v4 = vadd.f32 %v1768_v35, %v388_v50  ;;  %v1961_v19 = vmul.f32 %v1328_v9, %v1614_v52  ;;  %v1344_v2 = vld [vmem:[%s2700_s0 + $0xe1] sm:$0xff]  ;;  %v1241_v10 = vld [vmem:[%s2700_s0 + $0x3b0] sm:$0xff]  ;;  %v2732_v27 = vld [vmem:[#allocation18_spill] sm:$0xff] }
  0x56   :  { %2729 = vst [vmem:[#allocation12_spill] sm:$0xff] %v1945_v32  ;;  %594 = vst [vmem:[#allocation2 + $0x11] sm:$0xff] %v1945_v32  ;;  %v490_v38 = vadd.f32 %v2730_v23, %v464_v46  ;;  %v211_v60 = vadd.f32 %v203_v59, %v185_v57  ;;  %v338_v28 = vadd.f32 %v1838_v48, %v312_v21  ;;  %v1249_v48 = vld [vmem:[%s2700_s0 + $0x291] sm:$0xff] }
  0x57   :  { %v1974_v35 = vmul.f32 %v1336_v47, %v1617_v53  ;;  %v1977_v59 = vmul.f32 %v1344_v2, %v1638_v61  ;;  %v101_v56 = vmul.f32 %v1256_v16, %v1492_v6  ;;  %v440_v63 = vadd.f32 %v2732_v27, %v414_v4  ;;  %v2733_v23 = vld [vmem:[#allocation17_spill] sm:$0xff] }
  0x58   :  { %v516_v25 = vadd.f32 %v2731_v1, %v490_v38  ;;  %v236_v54 = vadd.f32 %v228_v44, %v211_v60  ;;  %v127_v46 = vmul.f32 %v1264_v37, %v1495_v7  ;;  %v364_v50 = vadd.f32 %v1845_v5, %v338_v28  ;;  %v2734_v38 = vld [vmem:[#allocation19_spill] sm:$0xff] }
  0x59   :  { %v109_v57 = vadd.f32 %v101_v56, %v1479_v3  ;;  %v152_v16 = vmul.f32 %v1272_v58, %v1509_v12  ;;  %v178_v21 = vmul.f32 %v1233_v43, %v1511_v13  ;;  %v465_v1 = vadd.f32 %v2734_v38, %v440_v63  ;;  %v1257_v37 = vld [vmem:[%s2700_s0 + $0x60] sm:$0xff]  ;;  %v2735_v56 = vld [vmem:[#allocation20_spill] sm:$0xff] }
  0x5a   :  { %v541_v32 = vadd.f32 %v2733_v23, %v516_v25  ;;  %v262_v4 = vadd.f32 %v254_v36, %v236_v54  ;;  %v204_v44 = vmul.f32 %v1241_v10, %v1522_v17  ;;  %v389_v60 = vadd.f32 %v1848_v55, %v364_v50  ;;  %v1265_v36 = vld [vmem:[%s2700_s0 + $0x180] sm:$0xff] }
  0x5b   :  { %v135_v5 = vadd.f32 %v127_v46, %v109_v57  ;;  %v229_v28 = vmul.f32 %v1249_v48, %v1524_v18  ;;  %v255_v58 = vmul.f32 %v1257_v37, %v1536_v24  ;;  %v491_v25 = vadd.f32 %v2735_v56, %v465_v1  ;;  %v1273_v10 = vld [vmem:[%s2700_s0 + $0x61] sm:$0xff]  ;;  %v2736_v57 = vld [vmem:[#allocation21_spill] sm:$0xff] }
  0x5c   :  { %vm549_vm1 = vcmp.gt.f32.partialorder %v541_v32, 0.0  ;;  %v557_v43 = vmul.f32 -1.9890641, %v541_v32  ;;  %v288_v27 = vadd.f32 %v280_v33, %v262_v4  ;;  %v415_v55 = vadd.f32 %v1852_v11, %v389_v60  ;;  %v1305_v33 = vld [vmem:[%s2700_s0 + $0x320] sm:$0xff] }
  0x5d   :  { %v160_v63 = vadd.f32 %v152_v16, %v135_v5  ;;  %v281_v54 = vmul.f32 %v1265_v36, %v1551_v29  ;;  %v2012_v46 = vmul.f32 %v1273_v10, %v1554_v30  ;;  %v1313_v48 = vld [vmem:[%s2700_s0 + $0x440] sm:$0xff]  ;;  %v517_v23 = vadd.f32 %v2736_v57, %v491_v25  ;;  %v2737_v5 = vld [vmem:[#allocation22_spill] sm:$0xff] }
  0x5e   :  { %v2020_v50 = vsel %vm549_vm1, %v541_v32, %v557_v43  ;;  %v313_v11 = vadd.f32 %v1917_v22, %v288_v27  ;;  %v2025_v16 = vmul.f32 %v1328_v9, %v1557_v31  ;;  %v1321_v38 = vld [vmem:[%s2700_s0 + $0x321] sm:$0xff]  ;;  %v441_v1 = vadd.f32 %v1855_v8, %v415_v55  ;;  %v1329_v8 = vld [vmem:[%s2700_s0 + $0xf0] sm:$0xff] }
  0x5f   :  { %595 = vst [vmem:[#allocation2 + $0x21] sm:$0xff] %v2020_v50  ;;  %v186_v4 = vadd.f32 %v178_v21, %v160_v63  ;;  %v2033_v60 = vmul.f32 %v1336_v47, %v1578_v39  ;;  %v2036_v32 = vmul.f32 %v1344_v2, %v1581_v40  ;;  %v542_v22 = vadd.f32 %v2737_v5, %v517_v23 }
  0x60   :  { %v339_v9 = vadd.f32 %v1920_v15, %v313_v11  ;;  %v2041_v43 = vmul.f32 %v1305_v33, %v1584_v41  ;;  %v2044_v56 = vmul.f32 %v1313_v48, %v1587_v42  ;;  %v466_v47 = vadd.f32 %v1862_v14, %v441_v1  ;;  %v1337_v15 = vld [vmem:[%s2700_s0 + $0x210] sm:$0xff]  ;;  %v1250_v11 = vld [vmem:[%s2700_s0 + $0x2a1] sm:$0xff] }
  0x61   :  { %v212_v21 = vadd.f32 %v204_v44, %v186_v4  ;;  %v2051_v2 = vmul.f32 %v1321_v38, %v1611_v51  ;;  %v2054_v25 = vmul.f32 %v1329_v8, %v1614_v52  ;;  %vm550_vm2 = vcmp.gt.f32.partialorder %v542_v22, 0.0  ;;  %v1345_v14 = vld [vmem:[%s2700_s0 + $0xf1] sm:$0xff]  ;;  %v1234_v44 = vld [vmem:[%s2700_s0 + $0x2a0] sm:$0xff] }
  0x62   :  { %v558_v27 = vmul.f32 -1.9890641, %v542_v22  ;;  %v365_v55 = vadd.f32 %v1928_v49, %v339_v9  ;;  %v2061_v63 = vmul.f32 %v1337_v15, %v1617_v53  ;;  %v492_v33 = vadd.f32 %v1865_v34, %v466_v47  ;;  %v1242_v49 = vld [vmem:[%s2700_s0 + $0x3c0] sm:$0xff] }
  0x63   :  { %v237_v48 = vadd.f32 %v229_v28, %v212_v21  ;;  %v2071_v57 = vmul.f32 %v1345_v14, %v1638_v61  ;;  %v102_v23 = vmul.f32 %v1257_v37, %v1492_v6  ;;  %v128_v34 = vmul.f32 %v1265_v36, %v1495_v7 }
  0x64   :  { %v2080_v38 = vsel %vm550_vm2, %v542_v22, %v558_v27  ;;  %v390_v1 = vadd.f32 %v1938_v20, %v365_v55  ;;  %v153_v28 = vmul.f32 %v1273_v10, %v1509_v12  ;;  %v518_v37 = vadd.f32 %v1878_v0, %v492_v33  ;;  %v1258_v22 = vld [vmem:[%s2700_s0 + $0x70] sm:$0xff] }
  0x65   :  { %2738 = vst [vmem:[#allocation11_spill] sm:$0xff] %v2080_v38  ;;  %596 = vst [vmem:[#allocation2 + $0x31] sm:$0xff] %v2080_v38  ;;  %v263_v4 = vadd.f32 %v255_v58, %v237_v48  ;;  %v110_v5 = vadd.f32 %v102_v23, %v1479_v3  ;;  %v179_v9 = vmul.f32 %v1234_v44, %v1511_v13  ;;  %v1266_v0 = vld [vmem:[%s2700_s0 + $0x190] sm:$0xff]  ;;  %v2739_v58 = vld [vmem:[#allocation23_spill] sm:$0xff] }
  0x66   :  { %v416_v47 = vadd.f32 %v1943_v62, %v390_v1  ;;  %v205_v20 = vmul.f32 %v1242_v49, %v1522_v17  ;;  %v230_v36 = vmul.f32 %v1250_v11, %v1524_v18  ;;  %v2096_v10 = vmul.f32 %v1258_v22, %v1536_v24  ;;  %v1274_v62 = vld [vmem:[%s2700_s0 + $0x71] sm:$0xff] }
  0x67   :  { %v543_v21 = vadd.f32 %v2739_v58, %v518_v37  ;;  %v289_v27 = vadd.f32 %v281_v54, %v263_v4  ;;  %v136_v55 = vadd.f32 %v128_v34, %v110_v5  ;;  %v2103_v44 = vmul.f32 %v1266_v0, %v1551_v29  ;;  %v1306_v33 = vld [vmem:[%s2700_s0 + $0x330] sm:$0xff] }
  0x68   :  { %v1314_v48 = vld [vmem:[%s2700_s0 + $0x450] sm:$0xff]  ;;  %v442_v23 = vadd.f32 %v1949_v26, %v416_v47  ;;  %v2116_v54 = vmul.f32 %v1274_v62, %v1554_v30  ;;  %v2119_v49 = vmul.f32 %v1329_v8, %v1557_v31  ;;  %v2122_v11 = vmul.f32 %v1337_v15, %v1578_v39  ;;  %v1330_v47 = vld [vmem:[%s2700_s0 + $0x100] sm:$0xff] }
  0x69   :  { %v1322_v1 = vld [vmem:[%s2700_s0 + $0x331] sm:$0xff]  ;;  %vm551_vm3 = vcmp.gt.f32.partialorder %v543_v21, 0.0  ;;  %v559_v34 = vmul.f32 -1.9890641, %v543_v21  ;;  %v314_v37 = vadd.f32 %v2012_v46, %v289_v27  ;;  %v161_v4 = vadd.f32 %v153_v28, %v136_v55  ;;  %v1338_v46 = vld [vmem:[%s2700_s0 + $0x220] sm:$0xff] }
  0x6a   :  { %v467_v26 = vadd.f32 %v1952_v45, %v442_v23  ;;  %v2130_v5 = vmul.f32 %v1345_v14, %v1581_v40  ;;  %v2133_v8 = vmul.f32 %v1306_v33, %v1584_v41  ;;  %v2136_v15 = vmul.f32 %v1314_v48, %v1587_v42  ;;  %v1346_v27 = vld [vmem:[%s2700_s0 + $0x101] sm:$0xff]  ;;  %v1235_v55 = vld [vmem:[%s2700_s0 + $0x2b0] sm:$0xff] }
  0x6b   :  { %v2144_v28 = vsel %vm551_vm3, %v543_v21, %v559_v34  ;;  %v340_v45 = vadd.f32 %v2025_v16, %v314_v37  ;;  %v187_v14 = vadd.f32 %v179_v9, %v161_v4  ;;  %v2148_v58 = vmul.f32 %v1322_v1, %v1611_v51  ;;  %v1243_v33 = vld [vmem:[%s2700_s0 + $0x3d0] sm:$0xff]  ;;  %v1259_v4 = vld [vmem:[%s2700_s0 + $0x80] sm:$0xff] }
  0x6c   :  { %2740 = vst [vmem:[#allocation13_spill] sm:$0xff] %v2144_v28  ;;  %597 = vst [vmem:[#allocation2 + $0x41] sm:$0xff] %v2144_v28  ;;  %v493_v16 = vadd.f32 %v1961_v19, %v467_v26  ;;  %v2162_v9 = vmul.f32 %v1330_v47, %v1614_v52  ;;  %v2165_v21 = vmul.f32 %v1338_v46, %v1617_v53  ;;  %v1251_v23 = vld [vmem:[%s2700_s0 + $0x2b1] sm:$0xff]  ;;  %v1267_v26 = vld [vmem:[%s2700_s0 + $0x1a0] sm:$0xff] }
  0x6d   :  { %v2168_v48 = vmul.f32 %v1346_v27, %v1638_v61  ;;  %v366_v1 = vadd.f32 %v2033_v60, %v340_v45  ;;  %v213_v34 = vadd.f32 %v205_v20, %v187_v14  ;;  %v103_v37 = vmul.f32 %v1258_v22, %v1492_v6  ;;  %v1275_v28 = vld [vmem:[%s2700_s0 + $0x81] sm:$0xff] }
  0x6e   :  { %v129_v19 = vmul.f32 %v1266_v0, %v1495_v7  ;;  %v519_v60 = vadd.f32 %v1974_v35, %v493_v16  ;;  %v154_v6 = vmul.f32 %v1274_v62, %v1509_v12  ;;  %v180_v7 = vmul.f32 %v1235_v55, %v1511_v13 }
  0x6f   :  { %v206_v22 = vmul.f32 %v1243_v33, %v1522_v17  ;;  %v391_v20 = vadd.f32 %v2036_v32, %v366_v1  ;;  %v238_v0 = vadd.f32 %v230_v36, %v213_v34  ;;  %v111_v45 = vadd.f32 %v103_v37, %v1479_v3  ;;  %v1307_v17 = vld [vmem:[%s2700_s0 + $0x340] sm:$0xff]  ;;  %v1331_v32 = vld [vmem:[%s2700_s0 + $0x110] sm:$0xff] }
  0x70   :  { %v231_v14 = vmul.f32 %v1251_v23, %v1524_v18  ;;  %v544_v38 = vadd.f32 %v1977_v59, %v519_v60  ;;  %v2200_v35 = vmul.f32 %v1259_v4, %v1536_v24  ;;  %v2203_v12 = vmul.f32 %v1267_v26, %v1551_v29  ;;  %v1315_v29 = vld [vmem:[%s2700_s0 + $0x460] sm:$0xff]  ;;  %v2284_v37 = vld [vmem:[#allocation2 + $0x10] sm:$0xff] }
  0x71   :  { %v2206_v13 = vmul.f32 %v1275_v28, %v1554_v30  ;;  %v417_v3 = vadd.f32 %v2041_v43, %v391_v20  ;;  %v264_v18 = vadd.f32 %v2096_v10, %v238_v0  ;;  %v137_v24 = vadd.f32 %v129_v19, %v111_v45  ;;  %v1323_v30 = vld [vmem:[%s2700_s0 + $0x341] sm:$0xff]  ;;  %v1339_v10 = vld [vmem:[%s2700_s0 + $0x230] sm:$0xff]  ;;  %v769_v20 = vld [vmem:[#allocation2 + $0x19] sm:$0x1] }
  0x72   :  { %v2218_v59 = vmul.f32 %v1330_v47, %v1557_v31  ;;  %vm552_vm4 = vcmp.gt.f32.partialorder %v544_v38, 0.0  ;;  %v560_v43 = vmul.f32 -1.9890641, %v544_v38  ;;  %v2230_v36 = vmul.f32 %v1338_v46, %v1578_v39  ;;  %v1347_v39 = vld [vmem:[%s2700_s0 + $0x111] sm:$0xff]  ;;  %s2277_s0 = sld [smem:[#allocation6 + $0x4]]  ;;  %v2741_v45 = vld [vmem:[#allocation12_spill] sm:$0xff] }
  0x73   :  { %v2233_v31 = vmul.f32 %v1346_v27, %v1581_v40  ;;  %v443_v62 = vadd.f32 %v2044_v56, %v417_v3  ;;  %v290_v47 = vadd.f32 %v2103_v44, %v264_v18  ;;  %v162_v28 = vadd.f32 %v154_v6, %v137_v24 }
  0x74   :  { %v2241_v55 = vmul.f32 %v1307_v17, %v1584_v41  ;;  %v2246_v40 = vsel %vm552_vm4, %v544_v38, %v560_v43  ;;  %v2249_v46 = vmul.f32 %v1315_v29, %v1587_v42  ;;  %v2252_v56 = vmul.f32 %v1323_v30, %v1611_v51  ;;  %v658_v42 = vld [vmem:[#allocation2 + $0x1] sm:$0xff] }
  0x75   :  { %v2255_v44 = vmul.f32 %v1331_v32, %v1614_v52  ;;  %598 = vst [vmem:[#allocation2 + $0x51] sm:$0xff] %v2246_v40  ;;  %v468_v41 = vadd.f32 %v2051_v2, %v443_v62  ;;  %v315_v27 = vadd.f32 %v2116_v54, %v290_v47  ;;  %v188_v33 = vadd.f32 %v180_v7, %v162_v28  ;;  %v604_v51 = vld [vmem:[#allocation2 + $0x8] sm:$0x1] }
  0x76   :  { %v2263_v38 = vmul.f32 %v1339_v10, %v1617_v53  ;;  %v2266_v16 = vmul.f32 %v1347_v39, %v1638_v61  ;;  %v2269_v52 = vstv %s2193_s22  ;;  %v2272_v23 = vstv %s2185_s9  ;;  %v659_v61 = vld [vmem:[#allocation2 + $0x9] sm:$0x1] }
  0x77   :  { %v2275_v1 = vstv %s2191_s10  ;;  %v494_v53 = vadd.f32 %v2054_v25, %v468_v41  ;;  %v341_v2 = vadd.f32 %v2119_v49, %v315_v27  ;;  %v214_v54 = vadd.f32 %v206_v22, %v188_v33  ;;  %v714_v22 = vld [vmem:[#allocation2 + $0x18] sm:$0x1] }
  0x78   :  { %v622_v34 = vmul.f32 0.0, %v2272_v23  ;;  %v677_v19 = vmul.f32 %v2275_v1, %v658_v42  ;;  %v2288_v4 = vstv %s2211_s25  ;;  %v2291_v26 = vstv %s2213_s11 }
  0x79   :  { %v623_v60 = vmul.f32 %v2272_v23, %v604_v51  ;;  %v520_v25 = vadd.f32 %v2061_v63, %v494_v53  ;;  %v367_v49 = vadd.f32 %v2122_v11, %v341_v2  ;;  %v239_v6 = vadd.f32 %v231_v14, %v214_v54 }
  0x7a   :  { %v640_v7 = vadd.f32 %v622_v34, %v2269_v52  ;;  %v732_v0 = vmul.f32 %v2288_v4, %v2284_v37  ;;  %v787_v17 = vmul.f32 %v2291_v26, %v2741_v45  ;;  %v678_v18 = vmul.f32 %v2275_v1, %v659_v61  ;;  %v952_v61 = vld [vmem:[#allocation2 + $0x9] sm:$0x1] }
  0x7b   :  { %v641_v3 = vadd.f32 %v623_v60, %v2269_v52  ;;  %v545_v63 = vadd.f32 %v2071_v57, %v520_v25  ;;  %v392_v11 = vadd.f32 %v2130_v5, %v367_v49  ;;  %v265_v14 = vadd.f32 %v2200_v35, %v239_v6 }
  0x7c   :  { %v695_v24 = vadd.f32 %v677_v19, %v640_v7  ;;  %v733_v30 = vmul.f32 %v2288_v4, %v714_v22  ;;  %v788_v32 = vmul.f32 %v2291_v26, %v769_v20  ;;  %v2313_v43 = vstv %s2257_s2 }
  0x7d   :  { %v696_v29 = vadd.f32 %v678_v18, %v641_v3  ;;  %vm553_vm5 = vcmp.gt.f32.partialorder %v545_v63, 0.0  ;;  %v561_v10 = vmul.f32 -1.9890641, %v545_v63  ;;  %v418_v57 = vadd.f32 %v2133_v8, %v392_v11  ;;  %v2355_v18 = vld [vmem:[#allocation2 + $0x20] sm:$0xff] }
  0x7e   :  { %v291_v62 = vadd.f32 %v2203_v12, %v265_v14  ;;  %v750_v5 = vadd.f32 %v732_v0, %v695_v24  ;;  %v2318_v35 = vstv %s2277_s0  ;;  %v2321_v28 = vstv %s2279_s29 }
  0x7f   :  { %v751_v47 = vadd.f32 %v733_v30, %v696_v29  ;;  %v2323_v39 = vsel %vm553_vm5, %v545_v63, %v561_v10  ;;  %v444_v41 = vadd.f32 %v2136_v15, %v418_v57  ;;  %v915_v33 = vmul.f32 0.0, %v2318_v35 }
  0x80   :  { %v316_v27 = vadd.f32 %v2206_v13, %v291_v62  ;;  %599 = vst [vmem:[#allocation2 + $0x61] sm:$0xff] %v2323_v39  ;;  %v805_v51 = vadd.f32 %v787_v17, %v750_v5  ;;  %v970_v12 = vmul.f32 %v2321_v28, %v658_v42  ;;  %v2331_v53 = vstv %s2294_s6  ;;  %v897_v13 = vld [vmem:[#allocation2 + $0x8] sm:$0x1] }
  0x81   :  { %v806_v8 = vadd.f32 %v788_v32, %v751_v47  ;;  %v469_v2 = vadd.f32 %v2148_v58, %v444_v41  ;;  %v933_v34 = vadd.f32 %v915_v33, %v2313_v43  ;;  %v1025_v15 = vmul.f32 %v2331_v53, %v2284_v37  ;;  %v1007_v58 = vld [vmem:[#allocation2 + $0x18] sm:$0x1]  ;;  %v661_v47 = vld [vmem:[#allocation2 + $0x19] sm:$0x1]  ;;  %v716_v41 = vld [vmem:[#allocation2 + $0x28] sm:$0x1] }
  0x82   :  { %v342_v54 = vadd.f32 %v2218_v59, %v316_v27  ;;  %vm823_vm6 = vcmp.gt.f32.partialorder %v805_v51, 0.0  ;;  %v841_v19 = vmul.f32 -1.9890641, %v805_v51  ;;  %v2341_v6 = vstv %s2308_s30  ;;  %v1062_v59 = vld [vmem:[#allocation2 + $0x19] sm:$0x1] }
  0x83   :  { %vm824_vm7 = vcmp.gt.f32.partialorder %v806_v8, 0.0  ;;  %v842_v60 = vmul.f32 -1.9890641, %v806_v8  ;;  %v495_v25 = vadd.f32 %v2162_v9, %v469_v2  ;;  %v988_v49 = vadd.f32 %v970_v12, %v933_v34  ;;  %v606_v32 = vld [vmem:[#allocation2 + $0x18] sm:$0x1] }
  0x84   :  { %v368_v42 = vadd.f32 %v2230_v36, %v342_v54  ;;  %v859_v7 = vsel %vm823_vm6, %v805_v51, %v841_v19  ;;  %v1080_v20 = vmul.f32 %v2341_v6, %v2741_v45  ;;  %v916_v0 = vmul.f32 %v2318_v35, %v897_v13  ;;  %v2380_v19 = vld [vmem:[#allocation2 + $0x30] sm:$0xff] }
  0x85   :  { %v860_v22 = vsel %vm824_vm7, %v806_v8, %v842_v60  ;;  %v521_v17 = vadd.f32 %v2165_v21, %v495_v25  ;;  %877 = vst [vmem:[%s2705_s5] sm:$0xff] %v859_v7  ;;  %v1043_v9 = vadd.f32 %v1025_v15, %v988_v49  ;;  %v971_v36 = vmul.f32 %v2321_v28, %v952_v61  ;;  %v771_v8 = vld [vmem:[#allocation2 + $0x29] sm:$0x1] }
  0x86   :  { %v393_v3 = vadd.f32 %v2233_v31, %v368_v42  ;;  %878 = vst [vmem:[%s2705_s5 + $0x8] sm:$0x1] %v860_v22  ;;  %v934_v63 = vadd.f32 %v916_v0, %v2313_v43  ;;  %v1026_v11 = vmul.f32 %v2331_v53, %v1007_v58  ;;  %v1081_v21 = vmul.f32 %v2341_v6, %v1062_v59  ;;  %v663_v49 = vld [vmem:[#allocation2 + $0x29] sm:$0x1]  ;;  %v608_v22 = vld [vmem:[#allocation2 + $0x28] sm:$0x1] }
  0x87   :  { %v624_v31 = vmul.f32 %v2284_v37, %v2272_v23  ;;  %v546_v14 = vadd.f32 %v2168_v48, %v521_v17  ;;  %v1098_v29 = vadd.f32 %v1080_v20, %v1043_v9  ;;  %v679_v30 = vmul.f32 %v2275_v1, %v2741_v45  ;;  %v2742_v17 = vld [vmem:[#allocation11_spill] sm:$0xff]  ;;  %v718_v9 = vld [vmem:[#allocation2 + $0x38] sm:$0x1] }
  0x88   :  { %v419_v24 = vadd.f32 %v2241_v55, %v393_v3  ;;  %v989_v10 = vadd.f32 %v971_v36, %v934_v63  ;;  %v734_v62 = vmul.f32 %v2288_v4, %v2355_v18  ;;  %v789_v5 = vmul.f32 %v2291_v26, %v2020_v50 }
  0x89   :  { %v642_v57 = vadd.f32 %v624_v31, %v2269_v52  ;;  %vm554_vm8 = vcmp.gt.f32.partialorder %v546_v14, 0.0  ;;  %v562_v48 = vmul.f32 -1.9890641, %v546_v14  ;;  %vm1116_vm9 = vcmp.gt.f32.partialorder %v1098_v29, 0.0 }
  0x8a   :  { %v445_v55 = vadd.f32 %v2249_v46, %v419_v24  ;;  %v1134_v27 = vmul.f32 -1.9890641, %v1098_v29  ;;  %v1044_v33 = vadd.f32 %v1026_v11, %v989_v10  ;;  %v625_v51 = vmul.f32 %v2272_v23, %v606_v32 }
  0x8b   :  { %v697_v45 = vadd.f32 %v679_v30, %v642_v57  ;;  %v2373_v12 = vsel %vm554_vm8, %v546_v14, %v562_v48  ;;  %v680_v54 = vmul.f32 %v2275_v1, %v661_v47  ;;  %v735_v34 = vmul.f32 %v2288_v4, %v716_v41  ;;  %v773_v30 = vld [vmem:[#allocation2 + $0x39] sm:$0x1]  ;;  %v2408_v57 = vld [vmem:[#allocation2 + $0x40] sm:$0xff] }
  0x8c   :  { %v470_v2 = vadd.f32 %v2252_v56, %v445_v55  ;;  %600 = vst [vmem:[#allocation2 + $0x71] sm:$0xff] %v2373_v12  ;;  %v1152_v15 = vsel %vm1116_vm9, %v1098_v29, %v1134_v27  ;;  %v1099_v13 = vadd.f32 %v1081_v21, %v1044_v33  ;;  %v643_v61 = vadd.f32 %v625_v51, %v2269_v52  ;;  %v665_v48 = vld [vmem:[#allocation2 + $0x39] sm:$0x1]  ;;  %v720_v51 = vld [vmem:[#allocation2 + $0x48] sm:$0x1] }
  0x8d   :  { %v752_v46 = vadd.f32 %v734_v62, %v697_v45  ;;  %1348 = vst [vmem:[%s2705_s5 + $0x90] sm:$0xff] %v1152_v15  ;;  %v790_v56 = vmul.f32 %v2291_v26, %v771_v8  ;;  %v626_v25 = vmul.f32 %v2355_v18, %v2272_v23  ;;  %v681_v42 = vmul.f32 %v2275_v1, %v2020_v50  ;;  %v610_v62 = vld [vmem:[#allocation2 + $0x38] sm:$0x1] }
  0x8e   :  { %v496_v60 = vadd.f32 %v2255_v44, %v470_v2  ;;  %vm1117_vm10 = vcmp.gt.f32.partialorder %v1099_v13, 0.0  ;;  %v1135_v58 = vmul.f32 -1.9890641, %v1099_v13  ;;  %v698_v7 = vadd.f32 %v680_v54, %v643_v61  ;;  %v775_v61 = vld [vmem:[#allocation2 + $0x49] sm:$0x1] }
  0x8f   :  { %v807_v59 = vadd.f32 %v789_v5, %v752_v46  ;;  %v644_v20 = vadd.f32 %v626_v25, %v2269_v52  ;;  %v736_v0 = vmul.f32 %v2288_v4, %v2380_v19  ;;  %v791_v3 = vmul.f32 %v2291_v26, %v2742_v17  ;;  %v2743_v25 = vld [vmem:[#allocation13_spill] sm:$0xff] }
  0x90   :  { %v522_v44 = vadd.f32 %v2263_v38, %v496_v60  ;;  %v1153_v36 = vsel %vm1117_vm10, %v1099_v13, %v1135_v58  ;;  %v753_v63 = vadd.f32 %v735_v34, %v698_v7  ;;  %v627_v21 = vmul.f32 %v2272_v23, %v608_v22  ;;  %v2426_v60 = vld [vmem:[#allocation2 + $0x50] sm:$0xff] }
  0x91   :  { %vm825_vm11 = vcmp.gt.f32.partialorder %v807_v59, 0.0  ;;  %v843_v50 = vmul.f32 -1.9890641, %v807_v59  ;;  %1349 = vst [vmem:[%s2705_s5 + $0x98] sm:$0x1] %v1153_v36  ;;  %v699_v38 = vadd.f32 %v681_v42, %v644_v20  ;;  %v682_v31 = vmul.f32 %v2275_v1, %v663_v49 }
  0x92   :  { %v547_v11 = vadd.f32 %v2266_v16, %v522_v44  ;;  %v808_v24 = vadd.f32 %v790_v56, %v753_v63  ;;  %v737_v29 = vmul.f32 %v2288_v4, %v718_v9  ;;  %v645_v10 = vadd.f32 %v627_v21, %v2269_v52 }
  0x93   :  { %v861_v14 = vsel %vm825_vm11, %v807_v59, %v843_v50  ;;  %v754_v16 = vadd.f32 %v736_v0, %v699_v38  ;;  %v628_v47 = vmul.f32 %v2380_v19, %v2272_v23  ;;  %v683_v41 = vmul.f32 %v2275_v1, %v2742_v17  ;;  %v612_v59 = vld [vmem:[#allocation2 + $0x48] sm:$0x1]  ;;  %v667_v0 = vld [vmem:[#allocation2 + $0x49] sm:$0x1]  ;;  %v722_v50 = vld [vmem:[#allocation2 + $0x58] sm:$0x1] }
  0x94   :  { %vm555_vm12 = vcmp.gt.f32.partialorder %v547_v11, 0.0  ;;  %v563_v32 = vmul.f32 -1.9890641, %v547_v11  ;;  %879 = vst [vmem:[%s2705_s5 + $0x10] sm:$0xff] %v861_v14  ;;  %vm826_vm13 = vcmp.gt.f32.partialorder %v808_v24, 0.0  ;;  %v700_v33 = vadd.f32 %v682_v31, %v645_v10 }
  0x95   :  { %v844_v5 = vmul.f32 -1.9890641, %v808_v24  ;;  %v809_v27 = vadd.f32 %v791_v3, %v754_v16  ;;  %v792_v45 = vmul.f32 %v2291_v26, %v773_v30  ;;  %v646_v2 = vadd.f32 %v628_v47, %v2269_v52 }
  0x96   :  { %v2414_v55 = vsel %vm555_vm12, %v547_v11, %v563_v32  ;;  %v738_v54 = vmul.f32 %v2288_v4, %v2408_v57  ;;  %v629_v34 = vmul.f32 %v2272_v23, %v610_v62  ;;  %v755_v13 = vadd.f32 %v737_v29, %v700_v33  ;;  %v777_v29 = vld [vmem:[#allocation2 + $0x59] sm:$0x1] }
  0x97   :  { %601 = vst [vmem:[#allocation2 + $0x81] sm:$0xff] %v2414_v55  ;;  %v862_v8 = vsel %vm826_vm13, %v808_v24, %v844_v5  ;;  %vm827_vm14 = vcmp.gt.f32.partialorder %v809_v27, 0.0  ;;  %v845_v15 = vmul.f32 -1.9890641, %v809_v27  ;;  %v684_v46 = vmul.f32 %v2275_v1, %v665_v48  ;;  %v614_v48 = vld [vmem:[#allocation2 + $0x58] sm:$0x1] }
  0x98   :  { %880 = vst [vmem:[%s2705_s5 + $0x18] sm:$0x1] %v862_v8  ;;  %v701_v56 = vadd.f32 %v683_v41, %v646_v2  ;;  %v793_v42 = vmul.f32 %v2291_v26, %v2743_v25  ;;  %v647_v49 = vadd.f32 %v629_v34, %v2269_v52  ;;  %v739_v58 = vmul.f32 %v2288_v4, %v720_v51  ;;  %v2454_v41 = vld [vmem:[#allocation2 + $0x60] sm:$0xff]  ;;  %v669_v8 = vld [vmem:[#allocation2 + $0x59] sm:$0x1] }
  0x99   :  { %v863_v7 = vsel %vm827_vm14, %v809_v27, %v845_v15  ;;  %v810_v22 = vadd.f32 %v792_v45, %v755_v13  ;;  %v630_v44 = vmul.f32 %v2408_v57, %v2272_v23  ;;  %v685_v20 = vmul.f32 %v2275_v1, %v2743_v25 }
  0x9a   :  { %881 = vst [vmem:[%s2705_s5 + $0x20] sm:$0xff] %v863_v7  ;;  %v756_v17 = vadd.f32 %v738_v54, %v701_v56  ;;  %v702_v3 = vadd.f32 %v684_v46, %v647_v49  ;;  %v794_v9 = vmul.f32 %v2291_v26, %v775_v61  ;;  %v740_v36 = vmul.f32 %v2288_v4, %v2426_v60  ;;  %v724_v56 = vld [vmem:[#allocation2 + $0x68] sm:$0x1] }
  0x9b   :  { %vm828_vm15 = vcmp.gt.f32.partialorder %v810_v22, 0.0  ;;  %v846_v63 = vmul.f32 -1.9890641, %v810_v22  ;;  %v648_v11 = vadd.f32 %v630_v44, %v2269_v52  ;;  %v631_v38 = vmul.f32 %v2272_v23, %v612_v59  ;;  %v2473_v44 = vld [vmem:[#allocation2 + $0x70] sm:$0xff] }
  0x9c   :  { %v811_v21 = vadd.f32 %v793_v42, %v756_v17  ;;  %v757_v31 = vadd.f32 %v739_v58, %v702_v3  ;;  %v795_v14 = vmul.f32 %v2291_v26, %v2246_v40  ;;  %v686_v24 = vmul.f32 %v2275_v1, %v667_v0 }
  0x9d   :  { %v864_v30 = vsel %vm828_vm15, %v810_v22, %v846_v63  ;;  %v703_v32 = vadd.f32 %v685_v20, %v648_v11  ;;  %v649_v16 = vadd.f32 %v631_v38, %v2269_v52  ;;  %v741_v10 = vmul.f32 %v2288_v4, %v722_v50  ;;  %v779_v22 = vld [vmem:[#allocation2 + $0x69] sm:$0x1] }
  0x9e   :  { %882 = vst [vmem:[%s2705_s5 + $0x28] sm:$0x1] %v864_v30  ;;  %vm829_vm0 = vcmp.gt.f32.partialorder %v811_v21, 0.0  ;;  %v847_v62 = vmul.f32 -1.9890641, %v811_v21  ;;  %v812_v5 = vadd.f32 %v794_v9, %v757_v31  ;;  %v632_v47 = vmul.f32 %v2426_v60, %v2272_v23 }
  0x9f   :  { %v758_v27 = vadd.f32 %v740_v36, %v703_v32  ;;  %v704_v33 = vadd.f32 %v686_v24, %v649_v16  ;;  %v796_v45 = vmul.f32 %v2291_v26, %v777_v29  ;;  %v687_v51 = vmul.f32 %v2275_v1, %v2246_v40  ;;  %v616_v9 = vld [vmem:[#allocation2 + $0x68] sm:$0x1]  ;;  %v671_v36 = vld [vmem:[#allocation2 + $0x69] sm:$0x1]  ;;  %v726_v24 = vld [vmem:[#allocation2 + $0x78] sm:$0x1] }
  0xa0   :  { %v865_v2 = vsel %vm829_vm0, %v811_v21, %v847_v62  ;;  %vm830_vm1 = vcmp.gt.f32.partialorder %v812_v5, 0.0  ;;  %v848_v54 = vmul.f32 -1.9890641, %v812_v5  ;;  %v650_v34 = vadd.f32 %v632_v47, %v2269_v52  ;;  %v781_v16 = vld [vmem:[#allocation2 + $0x79] sm:$0x1] }
  0xa1   :  { %883 = vst [vmem:[%s2705_s5 + $0x30] sm:$0xff] %v865_v2  ;;  %v813_v15 = vadd.f32 %v795_v14, %v758_v27  ;;  %v759_v13 = vadd.f32 %v741_v10, %v704_v33  ;;  %v742_v46 = vmul.f32 %v2288_v4, %v2454_v41  ;;  %v633_v61 = vmul.f32 %v2272_v23, %v614_v48 }
  0xa2   :  { %v866_v25 = vsel %vm830_vm1, %v812_v5, %v848_v54  ;;  %v705_v40 = vadd.f32 %v687_v51, %v650_v34  ;;  %v797_v42 = vmul.f32 %v2291_v26, %v2323_v39  ;;  %v688_v49 = vmul.f32 %v2275_v1, %v669_v8  ;;  %v618_v51 = vld [vmem:[#allocation2 + $0x78] sm:$0x1]  ;;  %v673_v8 = vld [vmem:[#allocation2 + $0x79] sm:$0x1] }
  0xa3   :  { %884 = vst [vmem:[%s2705_s5 + $0x38] sm:$0x1] %v866_v25  ;;  %vm831_vm2 = vcmp.gt.f32.partialorder %v813_v15, 0.0  ;;  %v849_v58 = vmul.f32 -1.9890641, %v813_v15  ;;  %v814_v59 = vadd.f32 %v796_v45, %v759_v13  ;;  %v651_v7 = vadd.f32 %v633_v61, %v2269_v52  ;;  %v2498_v45 = vld [vmem:[#allocation2 + $0x80] sm:$0xff] }
  0xa4   :  { %v760_v20 = vadd.f32 %v742_v46, %v705_v40  ;;  %v743_v0 = vmul.f32 %v2288_v4, %v724_v56  ;;  %v634_v17 = vmul.f32 %v2454_v41, %v2272_v23  ;;  %v689_v3 = vmul.f32 %v2275_v1, %v2323_v39 }
  0xa5   :  { %v867_v50 = vsel %vm831_vm2, %v813_v15, %v849_v58  ;;  %vm832_vm3 = vcmp.gt.f32.partialorder %v814_v59, 0.0  ;;  %v850_v63 = vmul.f32 -1.9890641, %v814_v59  ;;  %v706_v11 = vadd.f32 %v688_v49, %v651_v7  ;;  %v728_v7 = vld [vmem:[#allocation2 + $0x88] sm:$0x1] }
  0xa6   :  { %885 = vst [vmem:[%s2705_s5 + $0x40] sm:$0xff] %v867_v50  ;;  %v815_v38 = vadd.f32 %v797_v42, %v760_v20  ;;  %v798_v21 = vmul.f32 %v2291_v26, %v779_v22  ;;  %v652_v31 = vadd.f32 %v634_v17, %v2269_v52  ;;  %v744_v14 = vmul.f32 %v2288_v4, %v2473_v44  ;;  %v620_v50 = vld [vmem:[#allocation2 + $0x88] sm:$0x1] }
  0xa7   :  { %v868_v39 = vsel %vm832_vm3, %v814_v59, %v850_v63  ;;  %v761_v29 = vadd.f32 %v743_v0, %v706_v11  ;;  %v635_v30 = vmul.f32 %v2272_v23, %v616_v9  ;;  %v690_v32 = vmul.f32 %v2275_v1, %v671_v36  ;;  %v675_v63 = vld [vmem:[#allocation2 + $0x89] sm:$0x1] }
  0xa8   :  { %886 = vst [vmem:[%s2705_s5 + $0x48] sm:$0x1] %v868_v39  ;;  %vm833_vm4 = vcmp.gt.f32.partialorder %v815_v38, 0.0  ;;  %v851_v10 = vmul.f32 -1.9890641, %v815_v38  ;;  %v707_v62 = vadd.f32 %v689_v3, %v652_v31  ;;  %v799_v5 = vmul.f32 %v2291_v26, %v2373_v12  ;;  %v2522_v31 = vld [vmem:[#allocation2] sm:$0xff] }
  0xa9   :  { %v816_v47 = vadd.f32 %v798_v21, %v761_v29  ;;  %v653_v48 = vadd.f32 %v635_v30, %v2269_v52  ;;  %v745_v27 = vmul.f32 %v2288_v4, %v726_v24  ;;  %v636_v33 = vmul.f32 %v2473_v44, %v2272_v23  ;;  %v783_v3 = vld [vmem:[#allocation2 + $0x89] sm:$0x1]  ;;  %v730_v29 = vld [vmem:[#allocation2 + $0x98] sm:$0x1] }
  0xaa   :  { %v869_v2 = vsel %vm833_vm4, %v815_v38, %v851_v10  ;;  %v762_v54 = vadd.f32 %v744_v14, %v707_v62  ;;  %v800_v34 = vmul.f32 %v2291_v26, %v781_v16  ;;  %v691_v15 = vmul.f32 %v2275_v1, %v2373_v12  ;;  %v2531_v16 = vld [vmem:[#allocation2 + $0x91] sm:$0xff] }
  0xab   :  { %887 = vst [vmem:[%s2705_s5 + $0x50] sm:$0xff] %v869_v2  ;;  %vm834_vm5 = vcmp.gt.f32.partialorder %v816_v47, 0.0  ;;  %v852_v13 = vmul.f32 -1.9890641, %v816_v47  ;;  %v708_v46 = vadd.f32 %v690_v32, %v653_v48  ;;  %v654_v61 = vadd.f32 %v636_v33, %v2269_v52  ;;  %v785_v2 = vld [vmem:[#allocation2 + $0x99] sm:$0x1] }
  0xac   :  { %v817_v56 = vadd.f32 %v799_v5, %v762_v54  ;;  %v746_v25 = vmul.f32 %v2288_v4, %v2498_v45  ;;  %v637_v40 = vmul.f32 %v2272_v23, %v618_v51  ;;  %v692_v42 = vmul.f32 %v2275_v1, %v673_v8  ;;  %v953_v5 = vld [vmem:[#allocation2 + $0x11] sm:$0xff] }
  0xad   :  { %v870_v49 = vsel %vm834_vm5, %v816_v47, %v852_v13  ;;  %v763_v58 = vadd.f32 %v745_v27, %v708_v46  ;;  %v709_v12 = vadd.f32 %v691_v15, %v654_v61  ;;  %v801_v59 = vmul.f32 %v2291_v26, %v2414_v55  ;;  %v899_v54 = vld [vmem:[#allocation2 + $0x18] sm:$0x1] }
  0xae   :  { %888 = vst [vmem:[%s2705_s5 + $0x58] sm:$0x1] %v870_v49  ;;  %vm835_vm6 = vcmp.gt.f32.partialorder %v817_v56, 0.0  ;;  %v853_v22 = vmul.f32 -1.9890641, %v817_v56  ;;  %v655_v20 = vadd.f32 %v637_v40, %v2269_v52  ;;  %v638_v9 = vmul.f32 %v2498_v45, %v2272_v23 }
  0xaf   :  { %v818_v0 = vadd.f32 %v800_v34, %v763_v58  ;;  %v764_v17 = vadd.f32 %v746_v25, %v709_v12  ;;  %v693_v36 = vmul.f32 %v2275_v1, %v2414_v55  ;;  %v747_v21 = vmul.f32 %v2288_v4, %v728_v7  ;;  %v1009_v49 = vld [vmem:[#allocation2 + $0x28] sm:$0x1] }
  0xb0   :  { %v871_v11 = vsel %vm835_vm6, %v817_v56, %v853_v22  ;;  %v710_v38 = vadd.f32 %v692_v42, %v655_v20  ;;  %v748_v14 = vmul.f32 %v2522_v31, %v2288_v4  ;;  %v656_v55 = vadd.f32 %v638_v9, %v2269_v52  ;;  %v1063_v56 = vld [vmem:[#allocation2 + $0x21] sm:$0xff]  ;;  %v1064_v22 = vld [vmem:[#allocation2 + $0x29] sm:$0x1] }
  0xb1   :  { %889 = vst [vmem:[%s2705_s5 + $0x60] sm:$0xff] %v871_v11  ;;  %vm836_vm7 = vcmp.gt.f32.partialorder %v818_v0, 0.0  ;;  %v854_v24 = vmul.f32 -1.9890641, %v818_v0  ;;  %v819_v39 = vadd.f32 %v801_v59, %v764_v17  ;;  %v802_v32 = vmul.f32 %v2291_v26, %v783_v3 }
  0xb2   :  { %v765_v30 = vadd.f32 %v747_v21, %v710_v38  ;;  %v639_v10 = vmul.f32 %v2272_v23, %v620_v50  ;;  %v694_v62 = vmul.f32 %v2275_v1, %v675_v63  ;;  %v711_v27 = vadd.f32 %v693_v36, %v656_v55  ;;  %v954_v1 = vld [vmem:[#allocation2 + $0x19] sm:$0x1]  ;;  %v901_v50 = vld [vmem:[#allocation2 + $0x28] sm:$0x1]  ;;  %v956_v63 = vld [vmem:[#allocation2 + $0x29] sm:$0x1] }
  0xb3   :  { %v872_v47 = vsel %vm836_vm7, %v818_v0, %v854_v24  ;;  %vm837_vm8 = vcmp.gt.f32.partialorder %v819_v39, 0.0  ;;  %v855_v48 = vmul.f32 -1.9890641, %v819_v39  ;;  %v749_v8 = vmul.f32 %v2288_v4, %v730_v29  ;;  %v1065_v29 = vld [vmem:[#allocation2 + $0x31] sm:$0xff] }
  0xb4   :  { %890 = vst [vmem:[%s2705_s5 + $0x68] sm:$0x1] %v872_v47  ;;  %v820_v33 = vadd.f32 %v802_v32, %v765_v30  ;;  %v657_v51 = vadd.f32 %v639_v10, %v2269_v52  ;;  %v917_v23 = vmul.f32 %v2318_v35, %v2284_v37  ;;  %v766_v15 = vadd.f32 %v748_v14, %v711_v27 }
  0xb5   :  { %v873_v34 = vsel %vm837_vm8, %v819_v39, %v855_v48  ;;  %v803_v13 = vmul.f32 %v2291_v26, %v2531_v16  ;;  %v972_v46 = vmul.f32 %v2321_v28, %v953_v5  ;;  %v804_v25 = vmul.f32 %v2291_v26, %v785_v2 }
  0xb6   :  { %891 = vst [vmem:[%s2705_s5 + $0x70] sm:$0xff] %v873_v34  ;;  %vm838_vm9 = vcmp.gt.f32.partialorder %v820_v33, 0.0  ;;  %v856_v52 = vmul.f32 -1.9890641, %v820_v33  ;;  %v712_v4 = vadd.f32 %v694_v62, %v657_v51  ;;  %v935_v61 = vadd.f32 %v917_v23, %v2313_v43  ;;  %v1011_v62 = vld [vmem:[#allocation2 + $0x38] sm:$0x1] }
  0xb7   :  { %v821_v37 = vadd.f32 %v803_v13, %v766_v15  ;;  %v918_v40 = vmul.f32 %v2318_v35, %v899_v54  ;;  %v973_v42 = vmul.f32 %v2321_v28, %v954_v1  ;;  %v1027_v7 = vmul.f32 %v2331_v53, %v2355_v18  ;;  %v903_v23 = vld [vmem:[#allocation2 + $0x38] sm:$0x1]  ;;  %v958_v54 = vld [vmem:[#allocation2 + $0x39] sm:$0x1] }
  0xb8   :  { %v874_v58 = vsel %vm838_vm9, %v820_v33, %v856_v52  ;;  %v767_v12 = vadd.f32 %v749_v8, %v712_v4  ;;  %v990_v59 = vadd.f32 %v972_v46, %v935_v61  ;;  %v1082_v26 = vmul.f32 %v2341_v6, %v1063_v56  ;;  %v1066_v8 = vld [vmem:[#allocation2 + $0x39] sm:$0x1]  ;;  %v1067_v61 = vld [vmem:[#allocation2 + $0x41] sm:$0xff] }
  0xb9   :  { %892 = vst [vmem:[%s2705_s5 + $0x78] sm:$0x1] %v874_v58  ;;  %vm839_vm10 = vcmp.gt.f32.partialorder %v821_v37, 0.0  ;;  %v857_v20 = vmul.f32 -1.9890641, %v821_v37  ;;  %v936_v0 = vadd.f32 %v918_v40, %v2313_v43  ;;  %v1028_v9 = vmul.f32 %v2331_v53, %v1009_v49 }
  0xba   :  { %v822_v17 = vadd.f32 %v804_v25, %v767_v12  ;;  %v1045_v3 = vadd.f32 %v1027_v7, %v990_v59  ;;  %v919_v36 = vmul.f32 %v2318_v35, %v2355_v18  ;;  %v1083_v21 = vmul.f32 %v2341_v6, %v1064_v22  ;;  %v1013_v40 = vld [vmem:[#allocation2 + $0x48] sm:$0x1]  ;;  %v1068_v59 = vld [vmem:[#allocation2 + $0x49] sm:$0x1] }
  0xbb   :  { %v875_v11 = vsel %vm839_vm10, %v821_v37, %v857_v20  ;;  %v991_v38 = vadd.f32 %v973_v42, %v936_v0  ;;  %v974_v14 = vmul.f32 %v1063_v56, %v2321_v28  ;;  %v1029_v18 = vmul.f32 %v2331_v53, %v2380_v19 }
  0xbc   :  { %893 = vst [vmem:[%s2705_s5 + $0x80] sm:$0xff] %v875_v11  ;;  %vm840_vm11 = vcmp.gt.f32.partialorder %v822_v17, 0.0  ;;  %v858_v24 = vmul.f32 -1.9890641, %v822_v17  ;;  %v1100_v39 = vadd.f32 %v1082_v26, %v1045_v3  ;;  %v937_v55 = vadd.f32 %v919_v36, %v2313_v43  ;;  %v960_v36 = vld [vmem:[#allocation2 + $0x49] sm:$0x1] }
  0xbd   :  { %v1046_v30 = vadd.f32 %v1028_v9, %v991_v38  ;;  %v920_v32 = vmul.f32 %v2318_v35, %v901_v50  ;;  %v975_v10 = vmul.f32 %v2321_v28, %v956_v63  ;;  %v1084_v33 = vmul.f32 %v2341_v6, %v1065_v29  ;;  %v905_v9 = vld [vmem:[#allocation2 + $0x48] sm:$0x1] }
  0xbe   :  { %v876_v5 = vsel %vm840_vm11, %v822_v17, %v858_v24  ;;  %vm1118_vm12 = vcmp.gt.f32.partialorder %v1100_v39, 0.0  ;;  %v1136_v47 = vmul.f32 -1.9890641, %v1100_v39  ;;  %v992_v48 = vadd.f32 %v974_v14, %v937_v55 }
  0xbf   :  { %894 = vst [vmem:[%s2705_s5 + $0x88] sm:$0x1] %v876_v5  ;;  %v1101_v27 = vadd.f32 %v1083_v21, %v1046_v30  ;;  %v938_v51 = vadd.f32 %v920_v32, %v2313_v43  ;;  %v921_v2 = vmul.f32 %v2318_v35, %v2380_v19  ;;  %v1030_v15 = vmul.f32 %v2331_v53, %v1011_v62 }
  0xc0   :  { %v1154_v1 = vsel %vm1118_vm12, %v1100_v39, %v1136_v47  ;;  %v1047_v34 = vadd.f32 %v1029_v18, %v992_v48  ;;  %v976_v13 = vmul.f32 %v1065_v29, %v2321_v28  ;;  %v1085_v19 = vmul.f32 %v2341_v6, %v1066_v8  ;;  %v1069_v39 = vld [vmem:[#allocation2 + $0x51] sm:$0xff]  ;;  %v962_v8 = vld [vmem:[#allocation2 + $0x59] sm:$0x1] }
  0xc1   :  { %1350 = vst [vmem:[%s2705_s5 + $0xa0] sm:$0xff] %v1154_v1  ;;  %vm1119_vm13 = vcmp.gt.f32.partialorder %v1101_v27, 0.0  ;;  %v1137_v46 = vmul.f32 -1.9890641, %v1101_v27  ;;  %v993_v52 = vadd.f32 %v975_v10, %v938_v51  ;;  %v939_v4 = vadd.f32 %v921_v2, %v2313_v43  ;;  %v1015_v18 = vld [vmem:[#allocation2 + $0x58] sm:$0x1] }
  0xc2   :  { %v1102_v56 = vadd.f32 %v1084_v33, %v1047_v34  ;;  %v922_v37 = vmul.f32 %v2318_v35, %v903_v23  ;;  %v977_v25 = vmul.f32 %v2321_v28, %v958_v54  ;;  %v1031_v12 = vmul.f32 %v2331_v53, %v2408_v57  ;;  %v907_v51 = vld [vmem:[#allocation2 + $0x58] sm:$0x1] }
  0xc3   :  { %v1155_v42 = vsel %vm1119_vm13, %v1101_v27, %v1137_v46  ;;  %v1048_v49 = vadd.f32 %v1030_v15, %v993_v52  ;;  %v994_v58 = vadd.f32 %v976_v13, %v939_v4  ;;  %v1086_v22 = vmul.f32 %v2341_v6, %v1067_v61  ;;  %v1070_v27 = vld [vmem:[#allocation2 + $0x59] sm:$0x1]  ;;  %v1071_v46 = vld [vmem:[#allocation2 + $0x61] sm:$0xff] }
  0xc4   :  { %1351 = vst [vmem:[%s2705_s5 + $0xa8] sm:$0x1] %v1155_v42  ;;  %vm1120_vm14 = vcmp.gt.f32.partialorder %v1102_v56, 0.0  ;;  %v1138_v7 = vmul.f32 -1.9890641, %v1102_v56  ;;  %v940_v20 = vadd.f32 %v922_v37, %v2313_v43  ;;  %v1032_v17 = vmul.f32 %v2331_v53, %v1013_v40 }
  0xc5   :  { %v1103_v26 = vadd.f32 %v1085_v19, %v1048_v49  ;;  %v1049_v0 = vadd.f32 %v1031_v12, %v994_v58  ;;  %v923_v3 = vmul.f32 %v2318_v35, %v2408_v57  ;;  %v1087_v11 = vmul.f32 %v2341_v6, %v1068_v59  ;;  %v1072_v42 = vld [vmem:[#allocation2 + $0x69] sm:$0x1] }
  0xc6   :  { %v1156_v50 = vsel %vm1120_vm14, %v1102_v56, %v1138_v7  ;;  %v995_v63 = vadd.f32 %v977_v25, %v940_v20  ;;  %v978_v38 = vmul.f32 %v1067_v61, %v2321_v28  ;;  %v1033_v57 = vmul.f32 %v2331_v53, %v2426_v60  ;;  %v1017_v56 = vld [vmem:[#allocation2 + $0x68] sm:$0x1] }
  0xc7   :  { %1352 = vst [vmem:[%s2705_s5 + $0xb0] sm:$0xff] %v1156_v50  ;;  %vm1121_vm15 = vcmp.gt.f32.partialorder %v1103_v26, 0.0  ;;  %v1139_v21 = vmul.f32 -1.9890641, %v1103_v26  ;;  %v1104_v14 = vadd.f32 %v1086_v22, %v1049_v0  ;;  %v941_v24 = vadd.f32 %v923_v3, %v2313_v43  ;;  %v964_v0 = vld [vmem:[#allocation2 + $0x69] sm:$0x1] }
  0xc8   :  { %v1050_v55 = vadd.f32 %v1032_v17, %v995_v63  ;;  %v924_v29 = vmul.f32 %v2318_v35, %v905_v9  ;;  %v979_v30 = vmul.f32 %v2321_v28, %v960_v36  ;;  %v1088_v47 = vmul.f32 %v2341_v6, %v1069_v39 }
  0xc9   :  { %v1157_v32 = vsel %vm1121_vm15, %v1103_v26, %v1139_v21  ;;  %vm1122_vm0 = vcmp.gt.f32.partialorder %v1104_v14, 0.0  ;;  %v1140_v10 = vmul.f32 -1.9890641, %v1104_v14  ;;  %v996_v62 = vadd.f32 %v978_v38, %v941_v24  ;;  %v909_v26 = vld [vmem:[#allocation2 + $0x68] sm:$0x1]  ;;  %v1073_v38 = vld [vmem:[#allocation2 + $0x71] sm:$0xff] }
  0xca   :  { %1353 = vst [vmem:[%s2705_s5 + $0xb8] sm:$0x1] %v1157_v32  ;;  %v1105_v5 = vadd.f32 %v1087_v11, %v1050_v55  ;;  %v942_v48 = vadd.f32 %v924_v29, %v2313_v43  ;;  %v925_v33 = vmul.f32 %v2318_v35, %v2426_v60  ;;  %v1034_v54 = vmul.f32 %v2331_v53, %v1015_v18 }
  0xcb   :  { %v1158_v2 = vsel %vm1122_vm0, %v1104_v14, %v1140_v10  ;;  %v1051_v23 = vadd.f32 %v1033_v57, %v996_v62  ;;  %v980_v1 = vmul.f32 %v1069_v39, %v2321_v28  ;;  %v1089_v60 = vmul.f32 %v2341_v6, %v1070_v27  ;;  %v1019_v39 = vld [vmem:[#allocation2 + $0x78] sm:$0x1]  ;;  %v1074_v10 = vld [vmem:[#allocation2 + $0x79] sm:$0x1] }
  0xcc   :  { %1354 = vst [vmem:[%s2705_s5 + $0xc0] sm:$0xff] %v1158_v2  ;;  %vm1123_vm1 = vcmp.gt.f32.partialorder %v1105_v5, 0.0  ;;  %v1141_v34 = vmul.f32 -1.9890641, %v1105_v5  ;;  %v997_v15 = vadd.f32 %v979_v30, %v942_v48  ;;  %v943_v13 = vadd.f32 %v925_v33, %v2313_v43 }
  0xcd   :  { %v1106_v52 = vadd.f32 %v1088_v47, %v1051_v23  ;;  %v926_v4 = vmul.f32 %v2318_v35, %v907_v51  ;;  %v981_v61 = vmul.f32 %v2321_v28, %v962_v8  ;;  %v1035_v40 = vmul.f32 %v2331_v53, %v2454_v41  ;;  %v966_v47 = vld [vmem:[#allocation2 + $0x79] sm:$0x1] }
  0xce   :  { %v1159_v19 = vsel %vm1123_vm1, %v1105_v5, %v1141_v34  ;;  %v1052_v37 = vadd.f32 %v1034_v54, %v997_v15  ;;  %v998_v25 = vadd.f32 %v980_v1, %v943_v13  ;;  %v1090_v58 = vmul.f32 %v2341_v6, %v1071_v46  ;;  %v911_v5 = vld [vmem:[#allocation2 + $0x78] sm:$0x1]  ;;  %v1075_v54 = vld [vmem:[#allocation2 + $0x81] sm:$0xff] }
  0xcf   :  { %1355 = vst [vmem:[%s2705_s5 + $0xc8] sm:$0x1] %v1159_v19  ;;  %vm1124_vm2 = vcmp.gt.f32.partialorder %v1106_v52, 0.0  ;;  %v1142_v49 = vmul.f32 -1.9890641, %v1106_v52  ;;  %v944_v12 = vadd.f32 %v926_v4, %v2313_v43  ;;  %v1036_v22 = vmul.f32 %v2331_v53, %v1017_v56 }
  0xd0   :  { %v1107_v59 = vadd.f32 %v1089_v60, %v1052_v37  ;;  %v1053_v7 = vadd.f32 %v1035_v40, %v998_v25  ;;  %v927_v20 = vmul.f32 %v2318_v35, %v2454_v41  ;;  %v1091_v9 = vmul.f32 %v2341_v6, %v1072_v42  ;;  %v1021_v13 = vld [vmem:[#allocation2 + $0x88] sm:$0x1]  ;;  %v1076_v42 = vld [vmem:[#allocation2 + $0x89] sm:$0x1] }
  0xd1   :  { %v1160_v17 = vsel %vm1124_vm2, %v1106_v52, %v1142_v49  ;;  %v999_v3 = vadd.f32 %v981_v61, %v944_v12  ;;  %v982_v36 = vmul.f32 %v1071_v46, %v2321_v28  ;;  %v1037_v41 = vmul.f32 %v2331_v53, %v2473_v44  ;;  %v968_v12 = vld [vmem:[#allocation2 + $0x89] sm:$0x1] }
  0xd2   :  { %1356 = vst [vmem:[%s2705_s5 + $0xd0] sm:$0xff] %v1160_v17  ;;  %vm1125_vm3 = vcmp.gt.f32.partialorder %v1107_v59, 0.0  ;;  %v1143_v50 = vmul.f32 -1.9890641, %v1107_v59  ;;  %v1108_v63 = vadd.f32 %v1090_v58, %v1053_v7  ;;  %v945_v11 = vadd.f32 %v927_v20, %v2313_v43  ;;  %v913_v58 = vld [vmem:[#allocation2 + $0x88] sm:$0x1] }
  0xd3   :  { %v1054_v21 = vadd.f32 %v1036_v22, %v999_v3  ;;  %v928_v14 = vmul.f32 %v2318_v35, %v909_v26  ;;  %v983_v24 = vmul.f32 %v2321_v28, %v964_v0  ;;  %v1092_v18 = vmul.f32 %v2341_v6, %v1073_v38  ;;  %v1023_v3 = vld [vmem:[#allocation2 + $0x98] sm:$0x1] }
  0xd4   :  { %v1161_v55 = vsel %vm1125_vm3, %v1107_v59, %v1143_v50  ;;  %vm1126_vm4 = vcmp.gt.f32.partialorder %v1108_v63, 0.0  ;;  %v1144_v57 = vmul.f32 -1.9890641, %v1108_v63  ;;  %v1000_v29 = vadd.f32 %v982_v36, %v945_v11 }
  0xd5   :  { %1357 = vst [vmem:[%s2705_s5 + $0xd8] sm:$0x1] %v1161_v55  ;;  %v1109_v30 = vadd.f32 %v1091_v9, %v1054_v21  ;;  %v946_v32 = vadd.f32 %v928_v14, %v2313_v43  ;;  %v929_v62 = vmul.f32 %v2318_v35, %v2473_v44  ;;  %v1038_v33 = vmul.f32 %v2331_v53, %v1019_v39  ;;  %v1078_v39 = vld [vmem:[#allocation2 + $0x99] sm:$0x1] }
  0xd6   :  { %v1162_v48 = vsel %vm1126_vm4, %v1108_v63, %v1144_v57  ;;  %v1055_v27 = vadd.f32 %v1037_v41, %v1000_v29  ;;  %v984_v51 = vmul.f32 %v1073_v38, %v2321_v28  ;;  %v1093_v44 = vmul.f32 %v2341_v6, %v1074_v10 }
  0xd7   :  { %1358 = vst [vmem:[%s2705_s5 + $0xe0] sm:$0xff] %v1162_v48  ;;  %vm1127_vm5 = vcmp.gt.f32.partialorder %v1109_v30, 0.0  ;;  %v1145_v8 = vmul.f32 -1.9890641, %v1109_v30  ;;  %v1001_v2 = vadd.f32 %v983_v24, %v946_v32  ;;  %v947_v23 = vadd.f32 %v929_v62, %v2313_v43 }
  0xd8   :  { %v1110_v1 = vadd.f32 %v1092_v18, %v1055_v27  ;;  %v930_v34 = vmul.f32 %v2318_v35, %v911_v5  ;;  %v985_v15 = vmul.f32 %v2321_v28, %v966_v47  ;;  %v1039_v4 = vmul.f32 %v2331_v53, %v2498_v45 }
  0xd9   :  { %v1163_v46 = vsel %vm1127_vm5, %v1109_v30, %v1145_v8  ;;  %v1056_v52 = vadd.f32 %v1038_v33, %v1001_v2  ;;  %v1002_v60 = vadd.f32 %v984_v51, %v947_v23  ;;  %v1094_v56 = vmul.f32 %v2341_v6, %v1075_v54 }
  0xda   :  { %1359 = vst [vmem:[%s2705_s5 + $0xe8] sm:$0x1] %v1163_v46  ;;  %vm1128_vm6 = vcmp.gt.f32.partialorder %v1110_v1, 0.0  ;;  %v1146_v61 = vmul.f32 -1.9890641, %v1110_v1  ;;  %v948_v19 = vadd.f32 %v930_v34, %v2313_v43  ;;  %v1040_v40 = vmul.f32 %v2331_v53, %v1021_v13 }
  0xdb   :  { %v1111_v37 = vadd.f32 %v1093_v44, %v1056_v52  ;;  %v1057_v25 = vadd.f32 %v1039_v4, %v1002_v60  ;;  %v931_v49 = vmul.f32 %v2318_v35, %v2498_v45  ;;  %v986_v22 = vmul.f32 %v1075_v54, %v2321_v28 }
  0xdc   :  { %v1164_v59 = vsel %vm1128_vm6, %v1110_v1, %v1146_v61  ;;  %v1003_v7 = vadd.f32 %v985_v15, %v948_v19  ;;  %v1041_v20 = vmul.f32 %v2522_v31, %v2331_v53  ;;  %v1095_v9 = vmul.f32 %v2341_v6, %v1076_v42 }
  0xdd   :  { %1360 = vst [vmem:[%s2705_s5 + $0xf0] sm:$0xff] %v1164_v59  ;;  %vm1129_vm7 = vcmp.gt.f32.partialorder %v1111_v37, 0.0  ;;  %v1147_v26 = vmul.f32 -1.9890641, %v1111_v37  ;;  %v1112_v0 = vadd.f32 %v1094_v56, %v1057_v25  ;;  %v949_v17 = vadd.f32 %v931_v49, %v2313_v43 }
  0xde   :  { %v1058_v45 = vadd.f32 %v1040_v40, %v1003_v7  ;;  %v932_v36 = vmul.f32 %v2318_v35, %v913_v58  ;;  %v987_v50 = vmul.f32 %v2321_v28, %v968_v12  ;;  %v1042_v41 = vmul.f32 %v2331_v53, %v1023_v3 }
  0xdf   :  { %v1165_v63 = vsel %vm1129_vm7, %v1111_v37, %v1147_v26  ;;  %vm1130_vm8 = vcmp.gt.f32.partialorder %v1112_v0, 0.0  ;;  %v1148_v31 = vmul.f32 -1.9890641, %v1112_v0  ;;  %v1004_v11 = vadd.f32 %v986_v22, %v949_v17 }
  0xe0   :  { %1361 = vst [vmem:[%s2705_s5 + $0xf8] sm:$0x1] %v1165_v63  ;;  %v1113_v38 = vadd.f32 %v1095_v9, %v1058_v45  ;;  %v950_v21 = vadd.f32 %v932_v36, %v2313_v43  ;;  %v1096_v35 = vmul.f32 %v2341_v6, %v2531_v16  ;;  %v1097_v43 = vmul.f32 %v2341_v6, %v1078_v39 }
  0xe1   :  { %v1166_v14 = vsel %vm1130_vm8, %v1112_v0, %v1148_v31  ;;  %v1059_v24 = vadd.f32 %v1041_v20, %v1004_v11 }
  0xe2   :  { %1362 = vst [vmem:[%s2705_s5 + $0x100] sm:$0xff] %v1166_v14  ;;  %vm1131_vm9 = vcmp.gt.f32.partialorder %v1113_v38, 0.0  ;;  %v1149_v28 = vmul.f32 -1.9890641, %v1113_v38  ;;  %v1005_v55 = vadd.f32 %v987_v50, %v950_v21 }
  0xe3   :  { %v1114_v57 = vadd.f32 %v1096_v35, %v1059_v24 }
  0xe4   :  { %v1167_v29 = vsel %vm1131_vm9, %v1113_v38, %v1149_v28  ;;  %v1060_v30 = vadd.f32 %v1042_v41, %v1005_v55 }
  0xe5   :  { %1363 = vst [vmem:[%s2705_s5 + $0x108] sm:$0x1] %v1167_v29  ;;  %vm1132_vm10 = vcmp.gt.f32.partialorder %v1114_v57, 0.0  ;;  %v1150_v53 = vmul.f32 -1.9890641, %v1114_v57 }
  0xe6   :  { %v1115_v16 = vadd.f32 %v1097_v43, %v1060_v30 }
  0xe7   :  { %v1168_v18 = vsel %vm1132_vm10, %v1114_v57, %v1150_v53 }
  0xe8   :  { %1364 = vst [vmem:[%s2705_s5 + $0x110] sm:$0xff] %v1168_v18  ;;  %vm1133_vm11 = vcmp.gt.f32.partialorder %v1115_v16, 0.0  ;;  %v1151_v32 = vmul.f32 -1.9890641, %v1115_v16 }
  0xea   :  { %v1169_v10 = vsel %vm1133_vm11, %v1115_v16, %v1151_v32 }
  0xeb   :  { %1365 = vst [vmem:[%s2705_s5 + $0x118] sm:$0x1] %v1169_v10 }
  0xec   :  { %1193 = vsyncpa [#allocation5], 1 }
  0xed   :  { %1194 = vsyncpa [#allocation7], 1 }

</bundles_post_ra>
